<compile_context>
chip_gen: v5e
topology: v5e:2x2
jax: 0.10.0
libtpu: 0.0.40
codegen_flags: <defaults>
</compile_context>

<pallas_src>
import jax
import jax.numpy as jnp
from jax.experimental import pallas as pl
from jax.experimental.pallas import tpu as pltpu

EPS = 1e-5
EXPANSION = 4
LANE = 128


def _round_up(c, m=LANE):
    return ((c + m - 1) // m) * m


def bottleneck_kernel(x_ref, w1_ref, b1_ref,
                      w2_ref, b2_ref,
                      w3_ref, b3_ref, out_ref):
    # x_ref  : (1, H, W, Cin_p)  f32        w1_ref: (Cin_p, Cmid_p)       bf16
    # w2_ref : (3, 3*Cmid_p, Cmid_p) bf16   w3_ref: (Cmid_p, Cout_p)      bf16
    # b*     : (1, C_p) f32 folded BN bias  out_ref: (1, H, W, Cout_p)    f32
    _, H, W, cin = x_ref.shape
    cmid = w1_ref.shape[1]
    cout = w3_ref.shape[1]
    hw = H * W
    k3 = 3 * cmid
    bf16 = jnp.bfloat16
    f32 = jnp.float32

    # ---- conv1: 1x1 conv (channel matmul, BN scale pre-folded) + ReLU -----
    x0 = x_ref[0].reshape(hw, cin)                               # f32
    h1 = jnp.dot(x0.astype(bf16), w1_ref[...], preferred_element_type=f32)
    h1 = jnp.maximum(h1 + b1_ref[...], 0.0)                      # (hw, cmid) f32

    # ---- conv2: 3x3 conv, stride 1, pad 1 ----------------------------------
    # Fold the 3 dx taps into the contraction dim: P = [h1[x-1]|h1[x]|h1[x+1]]
    # along channels, then one deep (K = 3*Cmid) matmul per dy.  Shifted
    # tensors are built in bf16 (matmul input dtype) to halve VMEM traffic.
    h1b = h1.astype(bf16).reshape(H, W, cmid)
    zcol = jnp.zeros((H, 1, cmid), bf16)
    left = jnp.concatenate([zcol, h1b[:, :W - 1, :]], axis=1)    # h1[y, x-1]
    right = jnp.concatenate([h1b[:, 1:, :], zcol], axis=1)       # h1[y, x+1]
    p = jnp.concatenate([left, h1b, right], axis=-1)             # (H, W, 3*cmid)

    zrow = jnp.zeros((1, W, k3), bf16)
    up = jnp.concatenate([zrow, p[:H - 1]], axis=0)              # P[y-1]
    down = jnp.concatenate([p[1:], zrow], axis=0)                # P[y+1]

    acc = jnp.dot(up.reshape(hw, k3), w2_ref[0], preferred_element_type=f32)
    acc = acc + jnp.dot(p.reshape(hw, k3), w2_ref[1], preferred_element_type=f32)
    acc = acc + jnp.dot(down.reshape(hw, k3), w2_ref[2], preferred_element_type=f32)
    h2 = jnp.maximum(acc + b2_ref[...], 0.0)                     # (hw, cmid) f32

    # ---- conv3: 1x1 conv + bias + identity residual + ReLU -----------------
    h3 = jnp.dot(h2.astype(bf16), w3_ref[...], preferred_element_type=f32)
    h3 = h3 + b3_ref[...]
    res = x_ref[0].reshape(hw, cout)        # re-read residual (exact f32)
    out = jnp.maximum(h3 + res, 0.0)
    out_ref[0] = out.reshape(H, W, cout).astype(out_ref.dtype)


def fold_bn(gamma, beta, mean, var):
    scale = gamma / jnp.sqrt(var + EPS)
    bias = beta - mean * scale
    return scale, bias


def _pad_last(a, target):
    pad = target - a.shape[-1]
    if pad == 0:
        return a
    cfg = [(0, 0)] * (a.ndim - 1) + [(0, pad)]
    return jnp.pad(a, cfg)


def bottleneck_forward(x_nchw, params):
    """Fused Bottleneck forward (stride=1, downsample=None, use_se=False).

    x_nchw: (N, Cin, H, W) float32, returns (N, Cin, H, W) float32.
    """
    w1, w2, w3, bn1, bn2, bn3 = params
    n, cin, hh, ww = x_nchw.shape
    cmid = w1.shape[1]
    cout = w3.shape[1]
    assert cin == cout, "identity shortcut requires in_channel == out_channel*4"

    cin_p, cmid_p, cout_p = _round_up(cin), _round_up(cmid), _round_up(cout)

    # TODO(synk): the NCHW<->NHWC transposes + channel pad/slice are an extra
    # HBM pass; keep the surrounding model NHWC / 128-padded to drop them.
    x = jnp.transpose(x_nchw, (0, 2, 3, 1))                     # NHWC
    x = _pad_last(x, cin_p)

    # Fold eval-mode BN: scale goes into the conv weights (output channels),
    # bias stays as a per-channel add.  Padded channels get weight=bias=0 so
    # padded lanes remain exactly zero through the whole block.
    s1, b1 = fold_bn(*bn1)
    s2, b2 = fold_bn(*bn2)
    s3, b3 = fold_bn(*bn3)
    b1 = _pad_last(b1[None, :], cmid_p)
    b2 = _pad_last(b2[None, :], cmid_p)
    b3 = _pad_last(b3[None, :], cout_p)

    # Weights (BN-scaled) -> lane-dense bf16 MXU layouts.
    w1_s = w1 * s1[None, :]                                     # (Cin, Cmid)
    w2_s = w2 * s2[None, None, None, :]                         # (3, 3, Cmid, Cmid)
    w3_s = w3 * s3[None, :]                                     # (Cmid, Cout)
    w1_p = jnp.zeros((cin_p, cmid_p), jnp.float32).at[:cin, :cmid].set(w1_s)
    w3_p = jnp.zeros((cmid_p, cout_p), jnp.float32).at[:cmid, :cout].set(w3_s)
    w2_p = jnp.zeros((3, 3, cmid_p, cmid_p), jnp.float32
                     ).at[:, :, :cmid, :cmid].set(w2_s)
    w2_k = w2_p.reshape(3, 3 * cmid_p, cmid_p)       # [dy, dx*Cmid + cin, cout]
    w1_b = w1_p.astype(jnp.bfloat16)
    w2_b = w2_k.astype(jnp.bfloat16)
    w3_b = w3_p.astype(jnp.bfloat16)

    # VMEM budget: double-buffered x/out blocks + resident weights + in-kernel
    # intermediates (conv2 shifted tensors are bf16), with headroom (raises
    # v5e's 16 MiB default, stays under v7x's 64 MiB physical).
    blk = hh * ww
    weight_bytes = (cin_p * cmid_p + 9 * cmid_p * cmid_p + cmid_p * cout_p) * 2
    inter_bytes = blk * (cmid_p * 4            # h1 f32
                         + cmid_p * 2          # h1 bf16
                         + 3 * 3 * cmid_p * 2  # p / up / down bf16
                         + 2 * cmid_p * 4      # acc, h2 f32
                         + 2 * cout_p * 4)     # h3, out f32
    est = 2 * blk * (cin_p + cout_p) * 4 + weight_bytes + inter_bytes
    vmem_limit = int(min(48 << 20, max(32 << 20, 2 * est)))

    vec_spec = lambda c: pl.BlockSpec((1, c), lambda i: (0, 0))

    out_nhwc = pl.pallas_call(
        bottleneck_kernel,
        out_shape=jax.ShapeDtypeStruct((n, hh, ww, cout_p), x.dtype),
        grid=(n,),
        in_specs=[
            pl.BlockSpec((1, hh, ww, cin_p), lambda i: (i, 0, 0, 0)),
            pl.BlockSpec((cin_p, cmid_p), lambda i: (0, 0)),
            vec_spec(cmid_p),
            pl.BlockSpec((3, 3 * cmid_p, cmid_p), lambda i: (0, 0, 0)),
            vec_spec(cmid_p),
            pl.BlockSpec((cmid_p, cout_p), lambda i: (0, 0)),
            vec_spec(cout_p),
        ],
        out_specs=pl.BlockSpec((1, hh, ww, cout_p), lambda i: (i, 0, 0, 0)),
        compiler_params=pltpu.CompilerParams(
            dimension_semantics=("parallel",),
            vmem_limit_bytes=vmem_limit),
    )(x, w1_b, b1, w2_b, b2, w3_b, b3)

    out = out_nhwc[..., :cout]
    return jnp.transpose(out, (0, 3, 1, 2))                     # NHWC -> NCHW


def make_params(key, in_channel, out_channel):
    cmid = out_channel
    cout = out_channel * EXPANSION
    assert in_channel == cout, "identity residual requires in_channel == out_channel*4"
    ks = jax.random.split(key, 15)

    # PyTorch conv weights are OIHW; build them that way, then convert.
    w1_oihw = 0.1 * jax.random.normal(ks[0], (cmid, in_channel, 1, 1), jnp.float32)
    w2_oihw = 0.1 * jax.random.normal(ks[1], (cmid, cmid, 3, 3), jnp.float32)
    w3_oihw = 0.1 * jax.random.normal(ks[2], (cout, cmid, 1, 1), jnp.float32)

    def bn_params(kg, kb, km, kv, c):
        gamma = 1.0 + 0.1 * jax.random.normal(kg, (c,), jnp.float32)
        beta = 0.1 * jax.random.normal(kb, (c,), jnp.float32)
        mean = 0.1 * jax.random.normal(km, (c,), jnp.float32)
        var = jnp.abs(jax.random.normal(kv, (c,), jnp.float32)) + 0.5
        return gamma, beta, mean, var

    bn1 = bn_params(ks[3], ks[4], ks[5], ks[6], cmid)
    bn2 = bn_params(ks[7], ks[8], ks[9], ks[10], cmid)
    bn3 = bn_params(ks[11], ks[12], ks[13], ks[14], cout)

    # Kernel-side weight layouts (padding / BN-fold / bf16 done in the wrapper).
    w1 = jnp.transpose(w1_oihw[:, :, 0, 0], (1, 0))          # (Cin, Cmid)
    w2 = jnp.transpose(w2_oihw, (2, 3, 1, 0))                # (kh, kw, Cin, Cout)
    w3 = jnp.transpose(w3_oihw[:, :, 0, 0], (1, 0))          # (Cmid, Cout)

    kernel_params = (w1, w2, w3, bn1, bn2, bn3)
    torch_params = (w1_oihw, w2_oihw, w3_oihw, bn1, bn2, bn3)
    return kernel_params, torch_params


def reference_forward(x, torch_params):
    """Pure-JAX f32 reference matching the PyTorch module (eval-mode BN)."""
    w1, w2, w3, bn1, bn2, bn3 = torch_params

    def conv(h, w, stride=1, pad=0):
        return jax.lax.conv_general_dilated(
            h, w, (stride, stride), [(pad, pad), (pad, pad)],
            dimension_numbers=('NCHW', 'OIHW', 'NCHW'))

    def bn(h, gamma, beta, mean, var):
        s = gamma / jnp.sqrt(var + EPS)
        return h * s[None, :, None, None] + (beta - mean * s)[None, :, None, None]

    h = jax.nn.relu(bn(conv(x, w1), *bn1))
    h = jax.nn.relu(bn(conv(h, w2, 1, 1), *bn2))
    h = bn(conv(h, w3), *bn3)
    return jax.nn.relu(h + x)


if __name__ == "__main__":
    key = jax.random.PRNGKey(0)
    k_x, k_p = jax.random.split(key)

    # Small shapes: batch=2, out_channel=4 => in_channel = 4*4 = 16, spatial 16x16.
    N, out_channel = 2, 4
    in_channel = out_channel * EXPANSION
    H = W = 16

    x = jax.random.normal(k_x, (N, in_channel, H, W), jnp.float32)
    kernel_params, torch_params = make_params(k_p, in_channel, out_channel)

    out = jax.block_until_ready(bottleneck_forward(x, kernel_params))
    ref = reference_forward(x, torch_params)

    assert out.shape == ref.shape == (N, in_channel, H, W)
    max_err = float(jnp.max(jnp.abs(out - ref)))
    # bf16 MXU inputs with f32 accumulation + exact f32 residual -> small error.
    assert jnp.allclose(out, ref, rtol=2e-2, atol=2e-2), max_err

    print("KERNEL_OK")
</pallas_src>

<mosaic_0001>
module attributes {stable_mosaic.version = 11 : i64} {
  func.func @bottleneck_kernel(%arg0: i32, %arg1: memref<1x16x16x128xf32, #tpu.memory_space<vmem>>, %arg2: memref<128x128xbf16, #tpu.memory_space<vmem>>, %arg3: memref<1x128xf32, #tpu.memory_space<vmem>>, %arg4: memref<3x384x128xbf16, #tpu.memory_space<vmem>>, %arg5: memref<1x128xf32, #tpu.memory_space<vmem>>, %arg6: memref<128x128xbf16, #tpu.memory_space<vmem>>, %arg7: memref<1x128xf32, #tpu.memory_space<vmem>>, %arg8: memref<1x16x16x128xf32, #tpu.memory_space<vmem>>) attributes {dimension_semantics = [#tpu.dimension_semantics<parallel>], iteration_bounds = array<i64: 2>, scalar_prefetch = 0 : i64, scratch_operands = 0 : i64, tpu.core_type = #tpu.core_type<tc>, window_params = [{transform_indices = @transform_0, window_bounds = array<i64: 1, 16, 16, 128>}, {pipeline_mode = #tpu.pipeline_mode<synchronous>, transform_indices = @transform_1, window_bounds = array<i64: 128, 128>}, {pipeline_mode = #tpu.pipeline_mode<synchronous>, transform_indices = @transform_2, window_bounds = array<i64: 1, 128>}, {pipeline_mode = #tpu.pipeline_mode<synchronous>, transform_indices = @transform_3, window_bounds = array<i64: 3, 384, 128>}, {pipeline_mode = #tpu.pipeline_mode<synchronous>, transform_indices = @transform_4, window_bounds = array<i64: 1, 128>}, {pipeline_mode = #tpu.pipeline_mode<synchronous>, transform_indices = @transform_5, window_bounds = array<i64: 128, 128>}, {pipeline_mode = #tpu.pipeline_mode<synchronous>, transform_indices = @transform_6, window_bounds = array<i64: 1, 128>}, {transform_indices = @transform_7, window_bounds = array<i64: 1, 16, 16, 128>}]} {
    %c0 = arith.constant 0 : index
    %c0_0 = arith.constant 0 : index
    %c0_1 = arith.constant 0 : index
    %c0_2 = arith.constant 0 : index
    %0 = vector.load %arg1[%c0, %c0_0, %c0_1, %c0_2] : memref<1x16x16x128xf32, #tpu.memory_space<vmem>>, vector<1x16x16x128xf32>
    %1 = vector.shape_cast %0 : vector<1x16x16x128xf32> to vector<16x16x128xf32>
    %2 = vector.shape_cast %1 : vector<16x16x128xf32> to vector<256x128xf32>
    %3 = arith.truncf %2 : vector<256x128xf32> to vector<256x128xbf16>
    %c0_3 = arith.constant 0 : index
    %c0_4 = arith.constant 0 : index
    %4 = vector.load %arg2[%c0_3, %c0_4] : memref<128x128xbf16, #tpu.memory_space<vmem>>, vector<128x128xbf16>
    %cst = arith.constant dense<0.000000e+00> : vector<256x128xf32>
    %5 = tpu.matmul %3, %4, %cst {dimension_numbers = #tpu.dot_dimension_numbers<[1], [0], [0], [1], [0, 0, 1, 1], [], []>} : vector<256x128xbf16>, vector<128x128xbf16>, vector<256x128xf32> -> vector<256x128xf32>
    %c0_5 = arith.constant 0 : index
    %c0_6 = arith.constant 0 : index
    %6 = vector.load %arg3[%c0_5, %c0_6] : memref<1x128xf32, #tpu.memory_space<vmem>>, vector<1x128xf32>
    %7 = vector.broadcast %6 : vector<1x128xf32> to vector<256x128xf32>
    %8 = arith.addf %5, %7 : vector<256x128xf32>
    %cst_7 = arith.constant 0.000000e+00 : f32
    %9 = vector.broadcast %cst_7 : f32 to vector<256x128xf32>
    %10 = arith.maximumf %8, %9 : vector<256x128xf32>
    %11 = arith.truncf %10 : vector<256x128xf32> to vector<256x128xbf16>
    %12 = vector.shape_cast %11 : vector<256x128xbf16> to vector<16x16x128xbf16>
    %cst_8 = arith.constant 0.000000e+00 : bf16
    %13 = vector.broadcast %cst_8 : bf16 to vector<16x1x128xbf16>
    %14 = vector.extract_strided_slice %12 {offsets = [0, 0, 0], sizes = [16, 15, 128], strides = [1, 1, 1]} : vector<16x16x128xbf16> to vector<16x15x128xbf16>
    %15 = tpu.concatenate %13, %14 in 1 : vector<16x1x128xbf16>, vector<16x15x128xbf16> -> vector<16x16x128xbf16>
    %16 = vector.extract_strided_slice %12 {offsets = [0, 1, 0], sizes = [16, 15, 128], strides = [1, 1, 1]} : vector<16x16x128xbf16> to vector<16x15x128xbf16>
    %17 = tpu.concatenate %16, %13 in 1 : vector<16x15x128xbf16>, vector<16x1x128xbf16> -> vector<16x16x128xbf16>
    %18 = tpu.concatenate %15, %12, %17 in 2 : vector<16x16x128xbf16>, vector<16x16x128xbf16>, vector<16x16x128xbf16> -> vector<16x16x384xbf16>
    %cst_9 = arith.constant 0.000000e+00 : bf16
    %19 = vector.broadcast %cst_9 : bf16 to vector<1x16x384xbf16>
    %20 = vector.extract_strided_slice %18 {offsets = [0, 0, 0], sizes = [15, 16, 384], strides = [1, 1, 1]} : vector<16x16x384xbf16> to vector<15x16x384xbf16>
    %21 = tpu.concatenate %19, %20 in 0 : vector<1x16x384xbf16>, vector<15x16x384xbf16> -> vector<16x16x384xbf16>
    %22 = vector.extract_strided_slice %18 {offsets = [1, 0, 0], sizes = [15, 16, 384], strides = [1, 1, 1]} : vector<16x16x384xbf16> to vector<15x16x384xbf16>
    %23 = tpu.concatenate %22, %19 in 0 : vector<15x16x384xbf16>, vector<1x16x384xbf16> -> vector<16x16x384xbf16>
    %24 = vector.shape_cast %21 : vector<16x16x384xbf16> to vector<256x384xbf16>
    %c0_10 = arith.constant 0 : index
    %c0_11 = arith.constant 0 : index
    %c0_12 = arith.constant 0 : index
    %25 = vector.load %arg4[%c0_10, %c0_11, %c0_12] : memref<3x384x128xbf16, #tpu.memory_space<vmem>>, vector<1x384x128xbf16>
    %26 = vector.shape_cast %25 : vector<1x384x128xbf16> to vector<384x128xbf16>
    %cst_13 = arith.constant dense<0.000000e+00> : vector<256x128xf32>
    %27 = tpu.matmul %24, %26, %cst_13 {dimension_numbers = #tpu.dot_dimension_numbers<[1], [0], [0], [1], [0, 0, 1, 1], [], []>} : vector<256x384xbf16>, vector<384x128xbf16>, vector<256x128xf32> -> vector<256x128xf32>
    %28 = vector.shape_cast %18 : vector<16x16x384xbf16> to vector<256x384xbf16>
    %c1 = arith.constant 1 : index
    %c0_14 = arith.constant 0 : index
    %c0_15 = arith.constant 0 : index
    %29 = vector.load %arg4[%c1, %c0_14, %c0_15] : memref<3x384x128xbf16, #tpu.memory_space<vmem>>, vector<1x384x128xbf16>
    %30 = vector.shape_cast %29 : vector<1x384x128xbf16> to vector<384x128xbf16>
    %cst_16 = arith.constant dense<0.000000e+00> : vector<256x128xf32>
    %31 = tpu.matmul %28, %30, %cst_16 {dimension_numbers = #tpu.dot_dimension_numbers<[1], [0], [0], [1], [0, 0, 1, 1], [], []>} : vector<256x384xbf16>, vector<384x128xbf16>, vector<256x128xf32> -> vector<256x128xf32>
    %32 = arith.addf %27, %31 : vector<256x128xf32>
    %33 = vector.shape_cast %23 : vector<16x16x384xbf16> to vector<256x384xbf16>
    %c2 = arith.constant 2 : index
    %c0_17 = arith.constant 0 : index
    %c0_18 = arith.constant 0 : index
    %34 = vector.load %arg4[%c2, %c0_17, %c0_18] : memref<3x384x128xbf16, #tpu.memory_space<vmem>>, vector<1x384x128xbf16>
    %35 = vector.shape_cast %34 : vector<1x384x128xbf16> to vector<384x128xbf16>
    %cst_19 = arith.constant dense<0.000000e+00> : vector<256x128xf32>
    %36 = tpu.matmul %33, %35, %cst_19 {dimension_numbers = #tpu.dot_dimension_numbers<[1], [0], [0], [1], [0, 0, 1, 1], [], []>} : vector<256x384xbf16>, vector<384x128xbf16>, vector<256x128xf32> -> vector<256x128xf32>
    %37 = arith.addf %32, %36 : vector<256x128xf32>
    %c0_20 = arith.constant 0 : index
    %c0_21 = arith.constant 0 : index
    %38 = vector.load %arg5[%c0_20, %c0_21] : memref<1x128xf32, #tpu.memory_space<vmem>>, vector<1x128xf32>
    %39 = vector.broadcast %38 : vector<1x128xf32> to vector<256x128xf32>
    %40 = arith.addf %37, %39 : vector<256x128xf32>
    %cst_22 = arith.constant 0.000000e+00 : f32
    %41 = vector.broadcast %cst_22 : f32 to vector<256x128xf32>
    %42 = arith.maximumf %40, %41 : vector<256x128xf32>
    %43 = arith.truncf %42 : vector<256x128xf32> to vector<256x128xbf16>
    %c0_23 = arith.constant 0 : index
    %c0_24 = arith.constant 0 : index
    %44 = vector.load %arg6[%c0_23, %c0_24] : memref<128x128xbf16, #tpu.memory_space<vmem>>, vector<128x128xbf16>
    %cst_25 = arith.constant dense<0.000000e+00> : vector<256x128xf32>
    %45 = tpu.matmul %43, %44, %cst_25 {dimension_numbers = #tpu.dot_dimension_numbers<[1], [0], [0], [1], [0, 0, 1, 1], [], []>} : vector<256x128xbf16>, vector<128x128xbf16>, vector<256x128xf32> -> vector<256x128xf32>
    %c0_26 = arith.constant 0 : index
    %c0_27 = arith.constant 0 : index
    %46 = vector.load %arg7[%c0_26, %c0_27] : memref<1x128xf32, #tpu.memory_space<vmem>>, vector<1x128xf32>
    %47 = vector.broadcast %46 : vector<1x128xf32> to vector<256x128xf32>
    %48 = arith.addf %45, %47 : vector<256x128xf32>
    %c0_28 = arith.constant 0 : index
    %c0_29 = arith.constant 0 : index
    %c0_30 = arith.constant 0 : index
    %c0_31 = arith.constant 0 : index
    %49 = vector.load %arg1[%c0_28, %c0_29, %c0_30, %c0_31] : memref<1x16x16x128xf32, #tpu.memory_space<vmem>>, vector<1x16x16x128xf32>
    %50 = vector.shape_cast %49 : vector<1x16x16x128xf32> to vector<16x16x128xf32>
    %51 = vector.shape_cast %50 : vector<16x16x128xf32> to vector<256x128xf32>
    %52 = arith.addf %48, %51 : vector<256x128xf32>
    %cst_32 = arith.constant 0.000000e+00 : f32
    %53 = vector.broadcast %cst_32 : f32 to vector<256x128xf32>
    %54 = arith.maximumf %52, %53 : vector<256x128xf32>
    %55 = vector.shape_cast %54 : vector<256x128xf32> to vector<16x16x128xf32>
    %c0_33 = arith.constant 0 : index
    %c0_34 = arith.constant 0 : index
    %c0_35 = arith.constant 0 : index
    %c0_36 = arith.constant 0 : index
    %56 = vector.load %arg8[%c0_33, %c0_34, %c0_35, %c0_36] : memref<1x16x16x128xf32, #tpu.memory_space<vmem>>, vector<1x16x16x128xf32>
    %57 = vector.shape_cast %56 : vector<1x16x16x128xf32> to vector<16x16x128xf32>
    %58 = vector.shape_cast %55 : vector<16x16x128xf32> to vector<1x16x16x128xf32>
    tpu.vector_store %arg8[%c0_33, %c0_34, %c0_35, %c0_36], %58 {strides = array<i32>} : memref<1x16x16x128xf32, #tpu.memory_space<vmem>>, vector<1x16x16x128xf32>,
    return
  }
  func.func @transform_0(%arg0: i32) -> (i32, i32, i32, i32) {
    %c0_i32 = arith.constant 0 : i32
    %c0_i32_0 = arith.constant 0 : i32
    %c0_i32_1 = arith.constant 0 : i32
    %c0_i32_2 = arith.constant 0 : i32
    return %arg0, %c0_i32, %c0_i32_0, %c0_i32_1 : i32, i32, i32, i32
  }
  func.func @transform_1(%arg0: i32) -> (i32, i32) {
    %c0_i32 = arith.constant 0 : i32
    %c0_i32_0 = arith.constant 0 : i32
    %c0_i32_1 = arith.constant 0 : i32
    return %c0_i32, %c0_i32_0 : i32, i32
  }
  func.func @transform_2(%arg0: i32) -> (i32, i32) {
    %c0_i32 = arith.constant 0 : i32
    %c0_i32_0 = arith.constant 0 : i32
    %c0_i32_1 = arith.constant 0 : i32
    return %c0_i32, %c0_i32_0 : i32, i32
  }
  func.func @transform_3(%arg0: i32) -> (i32, i32, i32) {
    %c0_i32 = arith.constant 0 : i32
    %c0_i32_0 = arith.constant 0 : i32
    %c0_i32_1 = arith.constant 0 : i32
    %c0_i32_2 = arith.constant 0 : i32
    return %c0_i32, %c0_i32_0, %c0_i32_1 : i32, i32, i32
  }
  func.func @transform_4(%arg0: i32) -> (i32, i32) {
    %c0_i32 = arith.constant 0 : i32
    %c0_i32_0 = arith.constant 0 : i32
    %c0_i32_1 = arith.constant 0 : i32
    return %c0_i32, %c0_i32_0 : i32, i32
  }
  func.func @transform_5(%arg0: i32) -> (i32, i32) {
    %c0_i32 = arith.constant 0 : i32
    %c0_i32_0 = arith.constant 0 : i32
    %c0_i32_1 = arith.constant 0 : i32
    return %c0_i32, %c0_i32_0 : i32, i32
  }
  func.func @transform_6(%arg0: i32) -> (i32, i32) {
    %c0_i32 = arith.constant 0 : i32
    %c0_i32_0 = arith.constant 0 : i32
    %c0_i32_1 = arith.constant 0 : i32
    return %c0_i32, %c0_i32_0 : i32, i32
  }
  func.func @transform_7(%arg0: i32) -> (i32, i32, i32, i32) {
    %c0_i32 = arith.constant 0 : i32
    %c0_i32_0 = arith.constant 0 : i32
    %c0_i32_1 = arith.constant 0 : i32
    %c0_i32_2 = arith.constant 0 : i32
    return %arg0, %c0_i32, %c0_i32_0, %c0_i32_1 : i32, i32, i32, i32
  }
}

</mosaic_0001>

<bundles_post_ra>
// kernel: tpu_custom_call.1
= control target key start
LH: loop header
LB: loop body
LE: loop exit
PB: predicated region body
PF: predicated region fallthrough
CT: control target
= control target key end

     0   :  { %s4833_s0 = inlined_call_operand.hbm [shape: f32[2,16,16,128], index: 0, kind: input, shape index: {}]   ;;  %s4834_s1 = inlined_call_operand.hbm [shape: bf16[128,128], index: 1, kind: input, shape index: {}]   ;;  %s4835_s2 = inlined_call_operand.vmem [shape: f32[1,128], index: 2, kind: input, shape index: {}]   ;;  %s4836_s3 = inlined_call_operand.hbm [shape: bf16[3,384,128], index: 3, kind: input, shape index: {}]   ;;  %s4837_s4 = inlined_call_operand.vmem [shape: f32[1,128], index: 4, kind: input, shape index: {}]   ;;  %s4838_s5 = inlined_call_operand.hbm [shape: bf16[128,128], index: 5, kind: input, shape index: {}]   ;;  %s4839_s6 = inlined_call_operand.vmem [shape: f32[1,128], index: 6, kind: input, shape index: {}]   ;;  %s4840_s7 = inlined_call_operand.hbm [shape: f32[2,16,16,128], index: 7, kind: output, shape index: {}]  }
   0x1   :  { %4877 = sst [smem:[#allocation57_spill]] %s4834_s1 }
   0x2   :  { %12 = vsyncpa [#allocation3], 0 }
   0x3   :  { %14 = vsyncpa [#allocation3 + $0x1], 0 }
   0x4   :  { %15 = vsyncpa [#allocation6], 0 }
   0x5   :  { %16 = vsyncpa [#allocation9], 0 }
   0x6   :  { %17 = vsyncpa [#allocation4], 0 }
   0x7   :  { %19 = vsyncpa [#allocation4 + $0x1], 0  ;;  %s3646_s24 = smov 0   ;;  %s3648_s25 = smov 0  }
   0x8   :  { %s3650_s26 = smov 0   ;;  %s3652_s27 = smov 0  }
   0x9 LB: > { %s3667_s28 = sadd.s32 4294967295, %s3594_s27   ;;  %s2795_s29 = sadd.s32 4294967294, %s3594_s27   ;;  %s3594_s27 = sphi %s3652_s27, %s5011_s27   ;;  %s3590_s26 = sphi %s3650_s26, %s5010_s26   ;;  %s3586_s25 = sphi %s3648_s25, %s5009_s25   ;;  %s3582_s24 = sphi %s3646_s24, %s5008_s24  }
   0xa   : > { %p45_p0 = scmp.ne.s32.totalorder %s3586_s25, %s3582_s24  ;;  %p46_p1 = scmp.eq.s32.totalorder %s3667_s28, 0 }
   0xb   : > { %p195_p2 = scmp.eq.s32.totalorder %s3667_s28, 1  ;;  %p201_p3 = scmp.eq.s32.totalorder %s2795_s29, 1 }
   0xc   : > { %p3676_p4 = por %p46_p1, %p45_p0  ;;  %p2796_p5 = scmp.ge.s32.totalorder %s3594_s27, 1 }
   0xd   : > { %p3681_p6 = por %p201_p3, %p45_p0  ;;  %p208_p7 = scmp.lt.s32.totalorder %s3594_s27, 3 }
   0xe   : > { %s4880_s1 = sld [smem:[#allocation57_spill]]  ;;  %s3596_s13 = smov [#allocation5]  }
   0xf   : > { %p3689_p8 = pnand %p2796_p5, %p208_p7  ;;  %s221_s14 = sshll.u32 %s3596_s13, 4  ;;  %s222_s14 = int_to_ptr.vmem [resolvable:$true] %s221_s14 }
  0x10   : > { %s236_s18 = sshll.u32 %s4836_s3, 4  ;;  %s3597_s19 = smov 64   ;;  %s237_s18 = int_to_ptr.hbm [resolvable:$true] %s236_s18 }
  0x11   : > { %p3297_p9 = pneg %p3689_p8  ;;  %s3598_s20 = smov 4  }
  0x12   : > { %s3599_s21 = smov [#allocation7]   ;;  %s253_s9 = sshll.u32 %s4838_s5, 4  ;;  %s254_s9 = int_to_ptr.hbm [resolvable:$true] %s253_s9 }
  0x13   : > { %p3697_p10 = pnand %p3297_p9, %p46_p1  ;;  %s238_s22 = sshll.u32 %s3599_s21, 4  ;;  %s239_s22 = int_to_ptr.vmem [resolvable:$true] %s238_s22 }
  0x14   : > { %s219_s11 = sshll.u32 %s4880_s1, 4  ;;  %s3600_s10 = smov [#allocation8]   ;;  %s220_s11 = int_to_ptr.hbm [resolvable:$true] %s219_s11 }
  0x15   : > { %3300 = dma.hbm_to_vmem [thread:$0]  (!%p3697_p10), %s220_s11, 1024, %s222_s14, [#allocation6], %s3597_s19, %s3597_s19, %s3598_s20  }
  0x16   : > { %3303 = dma.hbm_to_vmem [thread:$0]  (!%p3697_p10), %s237_s18, 9216, %s239_s22, [#allocation6], %s3597_s19, %s3597_s19, %s3598_s20  }
  0x17   : > { %s255_s13 = sshll.u32 %s3600_s10, 4  ;;  %s3713_s11 = sadd.s32 1, %s3594_s27   ;;  %s256_s13 = int_to_ptr.vmem [resolvable:$true] %s255_s13 }
  0x18   : > { %3306 = dma.hbm_to_vmem [thread:$0]  (!%p3697_p10), %s254_s9, 1024, %s256_s13, [#allocation9], %s3597_s19, %s3597_s19, %s3598_s20  }
  0x19   : > { %s29_s14 = ssub.s32 %s3594_s27, %s3713_s11  ;;  %s32_s16 = sadd.s32 1, %s3590_s26 }
  0x1a   : > { %p30_p12 = scmp.eq.s32.totalorder %s29_s14, 0  ;;  %p39_p13 = scmp.ne.s32.totalorder %s3590_s26, %s3586_s25 }
  0x1b   : > { %p40_p0 = scmp.eq.s32.totalorder %s3594_s27, 0  ;;  %p3318_p3 = scmp.lt.s32.totalorder %s3594_s27, 2 }
  0x1c   : > { %s3725_s17 = scalar_select %p30_p12, %s3590_s26, %s32_s16  }
  0x1d   : > { %p41_p5 = por %p40_p0, %p39_p13  ;;  %p3729_p7 = por %p195_p2, %p39_p13 }
  0x1e   : > { %s272_s21 = sand.u32 1, %s3590_s26   ;;  %s3167_s22 = sshll.u32 %s3594_s27, 8 }
  0x1f   : > { %s2801_s15 = sshll.u32 %s272_s21, 8  ;;  %s281_s20 = scalar_lea.hbm %s4833_s0, %s3167_s22 }
  0x20   : > { %s282_s29 = sshll.u32 %s281_s20, 4  ;;  %s276_s9 = scalar_lea.vmem [#allocation2], %s2801_s15  ;;  %s283_s29 = int_to_ptr.hbm [resolvable:$true] %s282_s29 }
  0x21   : > { %s284_s10 = sshll.u32 %s276_s9, 4  ;;  %p3740_p9 = pnand %p3318_p3, %p41_p5  ;;  %s285_s10 = int_to_ptr.vmem [resolvable:$true] %s284_s10 }
  0x22   : > { %s273_s14 = scalar_lea.sflag [#allocation3], %s272_s21  ;;  %s3490_s16 = sshra.s32 %s283_s29, 4  ;;  %s3491_s16 = int_to_ptr.hbm [resolvable:$true] %s3490_s16 }
  0x23   : > { %s3492_s1 = scalar_lea.hbm %s3491_s16, 256  ;;  %p3494_p10 = pneg %p3740_p9 }
  0x24   : > { %p3493_p2 = scmp.ne.s32.totalorder %s3491_s16, %s3492_s1  ;;  %s3497_s23 = scalar_lea.hbm %s4833_s0, 512 }
  0x25   : > { %p3498_p0 = scmp.lt.s32.totalorder %s3491_s16, %s4833_s0  ;;  %p3499_p3 = scmp.lt.s32.totalorder %s3497_s23, %s3492_s1 }
  0x26   : > { %p3495_p12 = pnand %p3494_p10, %p3493_p2 }
  0x27   : > { %p3500_p5 = por %p3499_p3, %p3498_p0 }
  0x28   : > { %p3496_p13 = pneg %p3495_p12 }
  0x2a   : > { %p3501_p11 = pnand %p3500_p5, %p3496_p13 }
  0x2c   : > { %3504 = shalt.err (!%p3501_p11)
}
  0x2d   : > { %s3601_s21 = smov 128   ;;  %s3602_s9 = smov 8  }
  0x2e   : > { %3310 = dma.hbm_to_vmem [thread:$0]  (!%p3740_p9), %s283_s29, 4096, %s285_s10, %s273_s14, %s3601_s21, %s3601_s21, %s3602_s9  }
  0x2f   : > { %296 = sbr.rel (%p3689_p8) target bundleno = 1225 (0x4c9), region = 48 }
  0x34   : > { %s3757_s22 = sand.u32 1, %s3586_s25  }
  0x35   : > { %s2805_s16 = sshll.u32 %s3757_s22, 8  ;;  %s299_s1 = scalar_lea.sflag [#allocation3], %s3757_s22 }
  0x36   : > { %s3763_s15 = scalar_lea.vmem [#allocation2], %s2805_s16 }
  0x37   : > { %3565 = dma.done.wait (%p3676_p4), %s299_s1, 4096  }
  0x38   : > { %3567 = vsyncadd (%p3676_p4), %s299_s1, 4294963200 }
  0x39   : > { %3569 = dma.done.wait (%p46_p1), [#allocation6], 10240  }
  0x3a   : > { %3571 = vsyncadd (%p46_p1), [#allocation6], 4294957056 }
  0x3b   : > { %3573 = dma.done.wait (%p46_p1), [#allocation9], 1024  }
  0x3c   : > { %3575 = vsyncadd (%p46_p1), [#allocation9], 4294966272  ;;  %v3175_v0 = vld [vmem:[#allocation5 + $0x38] sm:$0xff]  ;;  %v3174_v1 = vld [vmem:[#allocation5 + $0x30] sm:$0xff]  ;;  %vm827_vm0 = vcmask 1040384   ;;  %vm894_vm3 = vcmask 1047552  }
  0x3d   : > { %466 = vmatpush.bf16.msra.mxu0 %v3175_v0  ;;  %3257 = vmatpush.bf16.msra.mxu3 %v3175_v0  ;;  %v3173_v2 = vld [vmem:[#allocation5 + $0x28] sm:$0xff]  ;;  %v3172_v3 = vld [vmem:[#allocation5 + $0x20] sm:$0xff]  ;;  %v3171_v4 = vld [vmem:[#allocation5 + $0x18] sm:$0xff]  ;;  %vm828_vm1 = vsmask.f32 256  ;;  %s4672_s23 = scalar_lea.vmem [#allocation10], %s2805_s16 }
  0x3e   : > { %v3170_v5 = vld [vmem:[#allocation5 + $0x10] sm:$0xff]  ;;  %v3169_v6 = vld [vmem:[#allocation5 + $0x8] sm:$0xff]  ;;  %v3168_v7 = vld [vmem:[#allocation5] sm:$0xff]  ;;  %vm895_vm4 = vsmask.f32 7424  ;;  %s3256_s19 = sshll.u32 %s3667_s28, 8 }
  0x3f   : > { %v350_v8 = vld [vmem:[%s3763_s15] sm:$0xff]  ;;  %v351_v9 = vld [vmem:[%s3763_s15 + $0x8] sm:$0xff]  ;;  %v352_v14 = vld [vmem:[%s3763_s15 + $0x10] sm:$0xff]  ;;  %s2689_s9 = scalar_lea.hbm %s4840_s7, %s3256_s19  ;;  %s2690_s16 = sshll.u32 %s4672_s23, 4  ;;  %s2691_s16 = int_to_ptr.vmem [resolvable:$true] %s2690_s16 }
  0x40   : > { %v374_v10 = vld [vmem:[%s3763_s15 + $0xc0] sm:$0xff]  ;;  %v375_v11 = vld [vmem:[%s3763_s15 + $0xc8] sm:$0xff]  ;;  %v382_v12 = vpack.c.bf16 %v351_v9, %v350_v8  ;;  %v353_v15 = vld [vmem:[%s3763_s15 + $0x18] sm:$0xff]  ;;  %s2692_s1 = sshll.u32 %s2689_s9, 4  ;;  %s2678_s30 = scalar_lea.sflag [#allocation4], %s3757_s22  ;;  %s2693_s1 = int_to_ptr.hbm [resolvable:$true] %s2692_s1 }
  0x41   : > { %467 = vmatpush.bf16.msra.mxu0 %v3174_v1  ;;  %3258 = vmatpush.bf16.msra.mxu3 %v3174_v1  ;;  %v394_v13 = vpack.c.bf16 %v375_v11, %v374_v10  ;;  %v376_v16 = vld [vmem:[%s3763_s15 + $0xd0] sm:$0xff]  ;;  %v377_v17 = vld [vmem:[%s3763_s15 + $0xd8] sm:$0xff]  ;;  %v383_v18 = vpack.c.bf16 %v353_v15, %v352_v14  ;;  %v354_v20 = vld [vmem:[%s3763_s15 + $0x20] sm:$0xff]  ;;  %s3534_s28 = sshra.s32 %s2693_s1, 4  ;;  %s3540_s13 = scalar_lea.hbm %s4840_s7, 512  ;;  %s3535_s28 = int_to_ptr.hbm [resolvable:$true] %s3534_s28 }
  0x42   : > { %v395_v19 = vpack.c.bf16 %v377_v17, %v376_v16  ;;  %v355_v21 = vld [vmem:[%s3763_s15 + $0x28] sm:$0xff]  ;;  %v378_v22 = vld [vmem:[%s3763_s15 + $0xe0] sm:$0xff]  ;;  %v356_v26 = vld [vmem:[%s3763_s15 + $0x30] sm:$0xff]  ;;  %s3536_s12 = scalar_lea.hbm %s3535_s28, 256  ;;  %p3541_p11 = scmp.lt.s32.totalorder %s3535_s28, %s4840_s7 }
  0x43   : > { %v379_v23 = vld [vmem:[%s3763_s15 + $0xe8] sm:$0xff]  ;;  %v384_v24 = vpack.c.bf16 %v355_v21, %v354_v20  ;;  %v357_v27 = vld [vmem:[%s3763_s15 + $0x38] sm:$0xff]  ;;  %v380_v28 = vld [vmem:[%s3763_s15 + $0xf0] sm:$0xff]  ;;  %p3537_p1 = scmp.ne.s32.totalorder %s3535_s28, %s3536_s12  ;;  %p3542_p9 = scmp.lt.s32.totalorder %s3540_s13, %s3536_s12 }
  0x44   : > { %v396_v25 = vpack.c.bf16 %v379_v23, %v378_v22  ;;  %v381_v29 = vld [vmem:[%s3763_s15 + $0xf8] sm:$0xff]  ;;  %v385_v30 = vpack.c.bf16 %v357_v27, %v356_v26  ;;  %v358_v32 = vld [vmem:[%s3763_s15 + $0x40] sm:$0xff]  ;;  %v359_v33 = vld [vmem:[%s3763_s15 + $0x48] sm:$0xff] }
  0x45   : > { %468 = vmatpush.bf16.msra.mxu0 %v3173_v2  ;;  %3259 = vmatpush.bf16.msra.mxu3 %v3173_v2  ;;  %v397_v31 = vpack.c.bf16 %v381_v29, %v380_v28  ;;  %v386_v34 = vpack.c.bf16 %v359_v33, %v358_v32  ;;  %v360_v35 = vld [vmem:[%s3763_s15 + $0x50] sm:$0xff]  ;;  %v361_v36 = vld [vmem:[%s3763_s15 + $0x58] sm:$0xff]  ;;  %v3213_v42 = vld [vmem:[#allocation7 + $0x128] sm:$0xff]  ;;  %p3538_p4 = pnand %p3537_p1, %p3729_p7  ;;  %p3543_p2 = por %p3542_p9, %p3541_p11 }
  0x46   : > { %v387_v37 = vpack.c.bf16 %v361_v36, %v360_v35  ;;  %v3215_v38 = vld [vmem:[#allocation7 + $0x138] sm:$0xff]  ;;  %v3214_v40 = vld [vmem:[#allocation7 + $0x130] sm:$0xff]  ;;  %v362_v43 = vld [vmem:[%s3763_s15 + $0x60] sm:$0xff] }
  0x47   : > { %v3207_v39 = vld [vmem:[#allocation7 + $0xf8] sm:$0xff]  ;;  %1259 = vmatpush.bf16.msra.mxu2 %v3215_v38  ;;  %v3206_v41 = vld [vmem:[#allocation7 + $0xf0] sm:$0xff]  ;;  %v363_v44 = vld [vmem:[%s3763_s15 + $0x68] sm:$0xff]  ;;  %p3539_p8 = pneg %p3538_p4 }
  0x48   : > { %1170 = vmatpush.bf16.msra.mxu1 %v3207_v39  ;;  %v3212_v45 = vld [vmem:[#allocation7 + $0x120] sm:$0xff]  ;;  %v388_v46 = vpack.c.bf16 %v363_v44, %v362_v43  ;;  %v3205_v47 = vld [vmem:[#allocation7 + $0xe8] sm:$0xff]  ;;  %v3211_v48 = vld [vmem:[#allocation7 + $0x118] sm:$0xff] }
  0x49   : > { %469 = vmatpush.bf16.msra.mxu0 %v3172_v3  ;;  %3260 = vmatpush.bf16.msra.mxu3 %v3172_v3  ;;  %v3204_v49 = vld [vmem:[#allocation7 + $0xe0] sm:$0xff]  ;;  %v3210_v50 = vld [vmem:[#allocation7 + $0x110] sm:$0xff]  ;;  %v3203_v51 = vld [vmem:[#allocation7 + $0xd8] sm:$0xff]  ;;  %p3544_p10 = pnand %p3543_p2, %p3539_p8 }
  0x4a   : > { %v3209_v52 = vld [vmem:[#allocation7 + $0x108] sm:$0xff]  ;;  %v364_v53 = vld [vmem:[%s3763_s15 + $0x70] sm:$0xff]  ;;  %v365_v54 = vld [vmem:[%s3763_s15 + $0x78] sm:$0xff] }
  0x4b   : > { %1260 = vmatpush.bf16.msra.mxu2 %v3214_v40  ;;  %v3202_v55 = vld [vmem:[#allocation7 + $0xd0] sm:$0xff]  ;;  %v3801_v56 = vld [vmem:[#allocation7 + $0x100] sm:$0xff]  ;;  %v389_v57 = vpack.c.bf16 %v365_v54, %v364_v53  ;;  %v3201_v58 = vld [vmem:[#allocation7 + $0xc8] sm:$0xff] }
  0x4c   : > { %1171 = vmatpush.bf16.msra.mxu1 %v3206_v41  ;;  %v3200_v59 = vld [vmem:[#allocation7 + $0xc0] sm:$0xff]  ;;  %v367_v61 = vld [vmem:[%s3763_s15 + $0x88] sm:$0xff]  ;;  %v3183_v1 = vld [vmem:[#allocation7 + $0x38] sm:$0xff] }
  0x4d   : > { %470 = vmatpush.bf16.msra.mxu0 %v3171_v4  ;;  %3261 = vmatpush.bf16.msra.mxu3 %v3171_v4  ;;  %v366_v60 = vld [vmem:[%s3763_s15 + $0x80] sm:$0xff]  ;;  %v3191_v2 = vld [vmem:[#allocation7 + $0x78] sm:$0xff]  ;;  %v3181_v11 = vld [vmem:[#allocation7 + $0x28] sm:$0xff] }
  0x4e   : > { %v3809_v62 = vld [vmem:[%s4835_s2] ss:$0 sm:$0xff]  ;;  %v390_v63 = vpack.c.bf16 %v367_v61, %v366_v60  ;;  %v368_v14 = vld [vmem:[%s3763_s15 + $0x90] sm:$0xff]  ;;  %v369_v15 = vld [vmem:[%s3763_s15 + $0x98] sm:$0xff] }
  0x4f   : > { %1261 = vmatpush.bf16.msra.mxu2 %v3213_v42  ;;  %v391_v23 = vpack.c.bf16 %v369_v15, %v368_v14  ;;  %v3179_v28 = vld [vmem:[#allocation7 + $0x18] sm:$0xff]  ;;  %vm3825_vm2 = vmand %vm827_vm0, %vm828_vm1  ;;  %v3190_v43 = vld [vmem:[#allocation7 + $0x70] sm:$0xff] }
  0x50   : > { %1172 = vmatpush.bf16.msra.mxu1 %v3205_v47  ;;  %vm4015_vm5 = vmand %vm894_vm3, %vm895_vm4 }
  0x51   : > { %471 = vmatpush.bf16.msra.mxu0 %v3170_v5  ;;  %3262 = vmatpush.bf16.msra.mxu3 %v3170_v5  ;;  %v3182_v5 = vld [vmem:[#allocation7 + $0x30] sm:$0xff] }
  0x53   : > { %1262 = vmatpush.bf16.msra.mxu2 %v3212_v45 }
  0x54   : > { %1173 = vmatpush.bf16.msra.mxu1 %v3204_v49 }
  0x55   : > { %472 = vmatpush.bf16.msra.mxu0 %v3169_v6  ;;  %3263 = vmatpush.bf16.msra.mxu3 %v3169_v6 }
  0x57   : > { %1263 = vmatpush.bf16.msra.mxu2 %v3211_v48 }
  0x58   : > { %1174 = vmatpush.bf16.msra.mxu1 %v3203_v51 }
  0x59   : > { %473 = vmatpush.bf16.msra.mxu0 %v3168_v7  ;;  %3264 = vmatpush.bf16.msra.mxu3 %v3168_v7 }
  0x5b   : > { %1264 = vmatpush.bf16.msra.mxu2 %v3210_v50 }
  0x5c   : > { %474 = vmatmul.bf16.vlgmr.msra.gmra.mxu0 %v382_v12  ;;  %534 = vmatmul.bf16.vlgmr.msra.gmra.mxu3 %v394_v13 }
  0x5d   : > { %3265 = vmatpush.bf16.msrb.mxu3 %v3207_v39  ;;  %1175 = vmatpush.bf16.msra.mxu1 %v3202_v55 }
  0x5e   : > { %1581 = vmatpush.bf16.msrb.mxu0 %v3183_v1 }
  0x5f   : > { %1265 = vmatpush.bf16.msra.mxu2 %v3209_v52 }
  0x61   : > { %3266 = vmatpush.bf16.msrb.mxu3 %v3206_v41  ;;  %1176 = vmatpush.bf16.msra.mxu1 %v3201_v58 }
  0x62   : > { %1582 = vmatpush.bf16.msrb.mxu0 %v3182_v5 }
  0x63   : > { %1266 = vmatpush.bf16.msra.mxu2 %v3801_v56 }
  0x65   : > { %3267 = vmatpush.bf16.msrb.mxu3 %v3205_v47  ;;  %1177 = vmatpush.bf16.msra.mxu1 %v3200_v59 }
  0x66   : > { %1583 = vmatpush.bf16.msrb.mxu0 %v3181_v11 }
  0x69   : > { %3268 = vmatpush.bf16.msrb.mxu3 %v3204_v49  ;;  %1670 = vmatpush.bf16.msrb.mxu1 %v3191_v2 }
  0x6c   : > { %479 = vmatmul.bf16.gmra.mxu0 %v383_v18  ;;  %539 = vmatmul.bf16.gmra.mxu3 %v395_v19  ;;  %v3180_v19 = vld [vmem:[#allocation7 + $0x20] sm:$0xff] }
  0x6d   : > { %3269 = vmatpush.bf16.msrb.mxu3 %v3203_v51  ;;  %1584 = vmatpush.bf16.msrb.mxu0 %v3180_v19  ;;  %v3177_v51 = vld [vmem:[#allocation7 + $0x8] sm:$0xff] }
  0x6e   : > { %1671 = vmatpush.bf16.msrb.mxu1 %v3190_v43 }
  0x71   : > { %3270 = vmatpush.bf16.msrb.mxu3 %v3202_v55  ;;  %1585 = vmatpush.bf16.msrb.mxu0 %v3179_v28  ;;  %v370_v55 = vld [vmem:[%s3763_s15 + $0xa0] sm:$0xff] }
  0x75   : > { %3271 = vmatpush.bf16.msrb.mxu3 %v3201_v58 }
  0x79   : > { %3272 = vmatpush.bf16.msrb.mxu3 %v3200_v59 }
  0x7c   : > { %484 = vmatmul.bf16.gmra.mxu0 %v384_v24  ;;  %544 = vmatmul.bf16.gmra.mxu3 %v396_v25 }
  0x7d   : > { %3273 = vmatpush.bf16.msra.mxu3 %v3215_v38  ;;  %v3178_v38 = vld [vmem:[#allocation7 + $0x10] sm:$0xff] }
  0x7e   : > { %1586 = vmatpush.bf16.msrb.mxu0 %v3178_v38 }
  0x81   : > { %3274 = vmatpush.bf16.msra.mxu3 %v3214_v40 }
  0x82   : > { %1587 = vmatpush.bf16.msrb.mxu0 %v3177_v51  ;;  %v3189_v51 = vld [vmem:[#allocation7 + $0x68] sm:$0xff] }
  0x83   : > { %1672 = vmatpush.bf16.msrb.mxu1 %v3189_v51 }
  0x85   : > { %3275 = vmatpush.bf16.msra.mxu3 %v3213_v42 }
  0x89   : > { %3276 = vmatpush.bf16.msra.mxu3 %v3212_v45 }
  0x8c   : > { %489 = vmatmul.bf16.gmra.mxu0 %v385_v30  ;;  %549 = vmatmul.bf16.gmra.mxu3 %v397_v31 }
  0x8d   : > { %3277 = vmatpush.bf16.msra.mxu3 %v3211_v48 }
  0x91   : > { %3278 = vmatpush.bf16.msra.mxu3 %v3210_v50 }
  0x95   : > { %3279 = vmatpush.bf16.msra.mxu3 %v3209_v52 }
  0x99   : > { %3280 = vmatpush.bf16.msra.mxu3 %v3801_v56  ;;  %v371_v56 = vld [vmem:[%s3763_s15 + $0xa8] sm:$0xff] }
  0x9a   : > { %v392_v61 = vpack.c.bf16 %v371_v56, %v370_v55 }
  0x9c   : > { %494 = vmatmul.bf16.gmra.mxu0 %v386_v34 }
  0xac   : > { %499 = vmatmul.bf16.gmra.mxu0 %v387_v37  ;;  %v3230_v37 = vld [vmem:[#allocation7 + $0x1b0] sm:$0xff] }
  0xbc   : > { %504 = vmatmul.bf16.gmra.mxu0 %v388_v46 }
  0xcc   : > { %509 = vmatmul.bf16.gmra.mxu0 %v389_v57 }
  0xd9   : > { %v475_v0 = vpop.f32.mrf.mxu0 }
  0xda   : > { %v476_v3 = vadd.f32 %v3809_v62, %v475_v0 }
  0xdc   : > { %514 = vmatmul.bf16.gmra.mxu0 %v390_v63  ;;  %v555_v6 = vmax.f32 %v476_v3, 0.0  ;;  %v3176_v63 = vld [vmem:[#allocation7] sm:$0xff] }
  0xdd   : > { %1588 = vmatpush.bf16.msrb.mxu0 %v3176_v63 }
  0xde   : > { %v587_v12 = vpack.c.bf16 %v555_v6, %v555_v6 }
  0xdf   : > { %v535_v4 = vpop.f32.mrf.mxu3 }
  0xe0   : > { %v536_v7 = vadd.f32 %v3809_v62, %v535_v4  ;;  %v651_v20 = vunpack.c.l.b16 %v587_v12 }
  0xe1   : > { %v477_v8 = vpop.f32.mrf.mxu0 }
  0xe2   : > { %v478_v9 = vadd.f32 %v3809_v62, %v477_v8  ;;  %v579_v10 = vmax.f32 %v536_v7, 0.0 }
  0xe4   : > { %v556_v13 = vmax.f32 %v478_v9, 0.0  ;;  %v611_v17 = vpack.c.bf16 %v579_v10, %v579_v10 }
  0xe6   : > { %v588_v16 = vpack.c.bf16 %v556_v13, %v556_v13  ;;  %v675_v27 = vunpack.c.l.b16 %v611_v17 }
  0xe7   : > { %v537_v18 = vpop.f32.mrf.mxu3 }
  0xe8   : > { %v652_v21 = vunpack.c.l.b16 %v588_v16  ;;  %v538_v22 = vadd.f32 %v3809_v62, %v537_v18 }
  0xe9   : > { %v480_v24 = vpop.f32.mrf.mxu0 }
  0xea   : > { %v3817_v25 = vpack.c.b16 %v652_v21, %v651_v20  ;;  %v580_v26 = vmax.f32 %v538_v22, 0.0  ;;  %v481_v30 = vadd.f32 %v3809_v62, %v480_v24 }
  0xec   : > { %v612_v29 = vpack.c.bf16 %v580_v26, %v580_v26  ;;  %519 = vmatmul.bf16.gmra.mxu0 %v391_v23  ;;  %1267 = vmatmul.bf16.vlgmr.msra.gmra.mxu2 %v3817_v25  ;;  %v700_v31 = vshrl.u32 %v3817_v25, 16  ;;  %v703_v32 = vshll.u32 %v3817_v25, 16  ;;  %v557_v40 = vmax.f32 %v481_v30, 0.0 }
  0xee   : > { %v676_v33 = vunpack.c.l.b16 %v612_v29  ;;  %v702_v34 = vrot.slane %v700_v31, 7  ;;  %v846_v35 = vrot.slane %v703_v32, 1  ;;  %v589_v52 = vpack.c.bf16 %v557_v40, %v557_v40 }
  0xef   : > { %v540_v36 = vpop.f32.mrf.mxu3 }
  0xf0   : > { %v3829_v39 = vpack.c.b16 %v676_v33, %v675_v27  ;;  %v541_v41 = vadd.f32 %v3809_v62, %v540_v36  ;;  %v705_v42 = vor.u32 %v703_v32, %v702_v34  ;;  %v3832_v45 = vor.u32 %v846_v35, %v700_v31  ;;  %v372_v33 = vld [vmem:[%s3763_s15 + $0xb0] sm:$0xff]  ;;  %v373_v34 = vld [vmem:[%s3763_s15 + $0xb8] sm:$0xff] }
  0xf1   : > { %v482_v44 = vpop.f32.mrf.mxu0  ;;  %v653_v0 = vunpack.c.l.b16 %v589_v52 }
  0xf2   : > { %4887 = vst [vmem:[#allocation15_spill] sm:$0xff] %v3829_v39  ;;  %v483_v46 = vadd.f32 %v3809_v62, %v482_v44  ;;  %v3837_v47 = vsel %vm3825_vm2, 0, %v705_v42  ;;  %v784_v48 = vshrl.u32 %v3829_v39, 16  ;;  %v581_v49 = vmax.f32 %v541_v41, 0.0 }
  0xf3   : > { %1178 = vmatmul.bf16.vlgmr.msra.gmra.mxu1 %v3837_v47  ;;  %v787_v50 = vshll.u32 %v3829_v39, 16  ;;  %v393_v41 = vpack.c.bf16 %v373_v34, %v372_v33 }
  0xf4   : > { %v558_v53 = vmax.f32 %v483_v46, 0.0  ;;  %v786_v54 = vrot.slane %v784_v48, 7  ;;  %v613_v59 = vpack.c.bf16 %v581_v49, %v581_v49 }
  0xf5   : > { %v870_v12 = vrot.slane %v787_v50, 1 }
  0xf6   : > { %v590_v57 = vpack.c.bf16 %v558_v53, %v558_v53  ;;  %v789_v58 = vor.u32 %v787_v50, %v786_v54  ;;  %v677_v7 = vunpack.c.l.b16 %v613_v59 }
  0xf7   : > { %v542_v60 = vpop.f32.mrf.mxu3  ;;  %v3856_v17 = vor.u32 %v870_v12, %v784_v48 }
  0xf8   : > { %v654_v1 = vunpack.c.l.b16 %v590_v57  ;;  %v543_v2 = vadd.f32 %v3809_v62, %v542_v60  ;;  %v3847_v3 = vsel %vm3825_vm2, 0, %v789_v58 }
  0xf9   : > { %4888 = vst [vmem:[#allocation16_spill] sm:$0xff] %v3847_v3  ;;  %v485_v4 = vpop.f32.mrf.mxu0  ;;  %1238 = vmatmul.bf16.vlgmr.msrb.gmra.mxu3 %v3847_v3 }
  0xfa   : > { %v3850_v5 = vpack.c.b16 %v654_v1, %v653_v0  ;;  %v582_v6 = vmax.f32 %v543_v2, 0.0  ;;  %v486_v9 = vadd.f32 %v3809_v62, %v485_v4 }
  0xfc   : > { %v614_v8 = vpack.c.bf16 %v582_v6, %v582_v6  ;;  %524 = vmatmul.bf16.gmra.mxu0 %v392_v61  ;;  %1272 = vmatmul.bf16.gmra.mxu2 %v3850_v5  ;;  %v707_v10 = vshrl.u32 %v3850_v5, 16  ;;  %v710_v11 = vshll.u32 %v3850_v5, 16  ;;  %v559_v19 = vmax.f32 %v486_v9, 0.0 }
  0xfe   : > { %v678_v13 = vunpack.c.l.b16 %v614_v8  ;;  %v709_v14 = vrot.slane %v707_v10, 7  ;;  %v848_v15 = vrot.slane %v710_v11, 1  ;;  %v591_v30 = vpack.c.bf16 %v559_v19, %v559_v19 }
  0xff   : > { %v545_v16 = vpop.f32.mrf.mxu3 }
 0x100   : > { %v3858_v18 = vpack.c.b16 %v678_v13, %v677_v7  ;;  %v546_v20 = vadd.f32 %v3809_v62, %v545_v16  ;;  %v712_v21 = vor.u32 %v710_v11, %v709_v14  ;;  %v3861_v23 = vor.u32 %v848_v15, %v707_v10 }
 0x101   : > { %v487_v22 = vpop.f32.mrf.mxu0  ;;  %v655_v42 = vunpack.c.l.b16 %v591_v30 }
 0x102   : > { %4889 = vst [vmem:[#allocation17_spill] sm:$0xff] %v3858_v18  ;;  %v488_v24 = vadd.f32 %v3809_v62, %v487_v22  ;;  %v3866_v26 = vsel %vm3825_vm2, 0, %v712_v21  ;;  %v791_v27 = vshrl.u32 %v3858_v18, 16  ;;  %v583_v28 = vmax.f32 %v546_v20, 0.0 }
 0x103   : > { %4890 = vst [vmem:[#allocation18_spill] sm:$0xff] %v3866_v26  ;;  %1183 = vmatmul.bf16.gmra.mxu1 %v3866_v26  ;;  %v794_v29 = vshll.u32 %v3858_v18, 16 }
 0x104   : > { %v560_v31 = vmax.f32 %v488_v24, 0.0  ;;  %v793_v32 = vrot.slane %v791_v27, 7  ;;  %v615_v38 = vpack.c.bf16 %v583_v28, %v583_v28 }
 0x105   : > { %v872_v57 = vrot.slane %v794_v29, 1 }
 0x106   : > { %v592_v35 = vpack.c.bf16 %v560_v31, %v560_v31  ;;  %v796_v36 = vor.u32 %v794_v29, %v793_v32  ;;  %v679_v52 = vunpack.c.l.b16 %v615_v38 }
 0x107   : > { %v547_v40 = vpop.f32.mrf.mxu3  ;;  %v3885_v63 = vor.u32 %v872_v57, %v791_v27 }
 0x108   : > { %v656_v43 = vunpack.c.l.b16 %v592_v35  ;;  %v548_v44 = vadd.f32 %v3809_v62, %v547_v40  ;;  %v3876_v46 = vsel %vm3825_vm2, 0, %v796_v36  ;;  %v4841_v35 = vmov 0  }
 0x109   : > { %4891 = vst [vmem:[#allocation19_spill] sm:$0xff] %v3876_v46  ;;  %v490_v48 = vpop.f32.mrf.mxu0  ;;  %1243 = vmatmul.bf16.gmra.mxu3 %v3876_v46 }
 0x10a   : > { %v3879_v49 = vpack.c.b16 %v656_v43, %v655_v42  ;;  %v584_v50 = vmax.f32 %v548_v44, 0.0  ;;  %v491_v54 = vadd.f32 %v3809_v62, %v490_v48 }
 0x10c   : > { %v616_v53 = vpack.c.bf16 %v584_v50, %v584_v50  ;;  %529 = vmatmul.bf16.gmra.mxu0 %v393_v41  ;;  %1277 = vmatmul.bf16.gmra.mxu2 %v3879_v49  ;;  %v714_v55 = vshrl.u32 %v3879_v49, 16  ;;  %v717_v56 = vshll.u32 %v3879_v49, 16  ;;  %v561_v1 = vmax.f32 %v491_v54, 0.0 }
 0x10e   : > { %v680_v58 = vunpack.c.l.b16 %v616_v53  ;;  %v716_v59 = vrot.slane %v714_v55, 7  ;;  %v850_v60 = vrot.slane %v717_v56, 1  ;;  %v593_v13 = vpack.c.bf16 %v561_v1, %v561_v1 }
 0x10f   : > { %v550_v61 = vpop.f32.mrf.mxu3 }
 0x110   : > { %v3887_v0 = vpack.c.b16 %v680_v58, %v679_v52  ;;  %v551_v2 = vadd.f32 %v3809_v62, %v550_v61  ;;  %v719_v4 = vor.u32 %v717_v56, %v716_v59  ;;  %v3890_v7 = vor.u32 %v850_v60, %v714_v55  ;;  %v3188_v52 = vld [vmem:[#allocation7 + $0x60] sm:$0xff] }
 0x111   : > { %v492_v6 = vpop.f32.mrf.mxu0  ;;  %v657_v22 = vunpack.c.l.b16 %v593_v13  ;;  %1673 = vmatpush.bf16.msrb.mxu1 %v3188_v52  ;;  %v3222_v52 = vld [vmem:[#allocation7 + $0x170] sm:$0xff] }
 0x112   : > { %4892 = vst [vmem:[#allocation20_spill] sm:$0xff] %v3887_v0  ;;  %v493_v8 = vadd.f32 %v3809_v62, %v492_v6  ;;  %v3895_v9 = vsel %vm3825_vm2, 0, %v719_v4  ;;  %v798_v10 = vshrl.u32 %v3887_v0, 16  ;;  %v585_v11 = vmax.f32 %v551_v2, 0.0 }
 0x113   : > { %4893 = vst [vmem:[#allocation21_spill] sm:$0xff] %v3895_v9  ;;  %1188 = vmatmul.bf16.gmra.mxu1 %v3895_v9  ;;  %v801_v12 = vshll.u32 %v3887_v0, 16 }
 0x114   : > { %v562_v14 = vmax.f32 %v493_v8, 0.0  ;;  %v800_v15 = vrot.slane %v798_v10, 7  ;;  %v617_v20 = vpack.c.bf16 %v585_v11, %v585_v11 }
 0x115   : > { %v874_v40 = vrot.slane %v801_v12, 1 }
 0x116   : > { %v594_v16 = vpack.c.bf16 %v562_v14, %v562_v14  ;;  %v803_v19 = vor.u32 %v801_v12, %v800_v15  ;;  %v681_v32 = vunpack.c.l.b16 %v617_v20 }
 0x117   : > { %v552_v21 = vpop.f32.mrf.mxu3  ;;  %v3913_v44 = vor.u32 %v874_v40, %v798_v10 }
 0x118   : > { %v658_v24 = vunpack.c.l.b16 %v594_v16  ;;  %v553_v27 = vadd.f32 %v3809_v62, %v552_v21  ;;  %v3903_v28 = vsel %vm3825_vm2, 0, %v803_v19 }
 0x119   : > { %4894 = vst [vmem:[#allocation22_spill] sm:$0xff] %v3903_v28  ;;  %v495_v29 = vpop.f32.mrf.mxu0  ;;  %1248 = vmatmul.bf16.gmra.mxu3 %v3903_v28 }
 0x11a   : > { %v3906_v30 = vpack.c.b16 %v658_v24, %v657_v22  ;;  %v586_v31 = vmax.f32 %v553_v27, 0.0  ;;  %v496_v34 = vadd.f32 %v3809_v62, %v495_v29  ;;  %4895 = vst [vmem:[#allocation23_spill] sm:$0xff] %v3913_v44 }
 0x11c   : > { %v618_v33 = vpack.c.bf16 %v586_v31, %v586_v31  ;;  %1282 = vmatmul.bf16.gmra.mxu2 %v3906_v30  ;;  %1589 = vmatmul.bf16.vlgmr.msrb.gmra.mxu0 %v4841_v35  ;;  %v721_v36 = vshrl.u32 %v3906_v30, 16  ;;  %v724_v38 = vshll.u32 %v3906_v30, 16  ;;  %v563_v50 = vmax.f32 %v496_v34, 0.0 }
 0x11e   : > { %v682_v41 = vunpack.c.l.b16 %v618_v33  ;;  %v723_v42 = vrot.slane %v721_v36, 7  ;;  %v852_v43 = vrot.slane %v724_v38, 1  ;;  %v595_v59 = vpack.c.bf16 %v563_v50, %v563_v50 }
 0x120   : > { %v3915_v48 = vpack.c.b16 %v682_v41, %v681_v32  ;;  %v726_v51 = vor.u32 %v724_v38, %v723_v42  ;;  %v3917_v53 = vor.u32 %v852_v43, %v721_v36  ;;  %v659_v4 = vunpack.c.l.b16 %v595_v59  ;;  %v3223_v38 = vld [vmem:[#allocation7 + $0x178] sm:$0xff]  ;;  %v3221_v59 = vld [vmem:[#allocation7 + $0x168] sm:$0xff] }
 0x121   : > { %v497_v54 = vpop.f32.mrf.mxu0  ;;  %v3187_v42 = vld [vmem:[#allocation7 + $0x58] sm:$0xff]  ;;  %1348 = vmatpush.bf16.msrb.mxu3 %v3223_v38  ;;  %v3217_v38 = vld [vmem:[#allocation7 + $0x148] sm:$0xff] }
 0x122   : > { %4896 = vst [vmem:[#allocation24_spill] sm:$0xff] %v3915_v48  ;;  %v498_v55 = vadd.f32 %v3809_v62, %v497_v54  ;;  %v3922_v56 = vsel %vm3825_vm2, 0, %v726_v51  ;;  %v805_v57 = vshrl.u32 %v3915_v48, 16  ;;  %v808_v58 = vshll.u32 %v3915_v48, 16  ;;  %1674 = vmatpush.bf16.msrb.mxu1 %v3187_v42 }
 0x123   : > { %4897 = vst [vmem:[#allocation25_spill] sm:$0xff] %v3922_v56  ;;  %1193 = vmatmul.bf16.gmra.mxu1 %v3922_v56 }
 0x124   : > { %v564_v60 = vmax.f32 %v498_v55, 0.0  ;;  %v807_v61 = vrot.slane %v805_v57, 7  ;;  %v876_v15 = vrot.slane %v808_v58, 1 }
 0x125   : > { %1349 = vmatpush.bf16.msrb.mxu3 %v3222_v52 }
 0x126   : > { %v596_v1 = vpack.c.bf16 %v564_v60, %v564_v60  ;;  %v810_v2 = vor.u32 %v808_v58, %v807_v61  ;;  %v3939_v20 = vor.u32 %v876_v15, %v805_v57  ;;  %v3219_v15 = vld [vmem:[#allocation7 + $0x158] sm:$0xff] }
 0x128   : > { %v660_v6 = vunpack.c.l.b16 %v596_v1  ;;  %v3929_v8 = vsel %vm3825_vm2, 0, %v810_v2  ;;  %4899 = vst [vmem:[#allocation27_spill] sm:$0xff] %v3939_v20 }
 0x129   : > { %4898 = vst [vmem:[#allocation26_spill] sm:$0xff] %v3929_v8  ;;  %v500_v10 = vpop.f32.mrf.mxu0  ;;  %1253 = vmatmul.bf16.gmra.mxu3 %v3929_v8  ;;  %v3239_v8 = vld [vmem:[#allocation7 + $0x1f8] sm:$0xff] }
 0x12a   : > { %v3932_v11 = vpack.c.b16 %v660_v6, %v659_v4  ;;  %v501_v12 = vadd.f32 %v3809_v62, %v500_v10  ;;  %1350 = vmatpush.bf16.msrb.mxu3 %v3221_v59  ;;  %v3220_v10 = vld [vmem:[#allocation7 + $0x160] sm:$0xff]  ;;  %2130 = vmatpush.bf16.msra.mxu0 %v3239_v8 }
 0x12c   : > { %1287 = vmatmul.bf16.gmra.mxu2 %v3932_v11  ;;  %1594 = vmatmul.bf16.gmra.mxu0 %v3837_v47  ;;  %v728_v13 = vshrl.u32 %v3932_v11, 16  ;;  %v731_v14 = vshll.u32 %v3932_v11, 16  ;;  %v565_v21 = vmax.f32 %v501_v12, 0.0 }
 0x12e   : > { %v730_v16 = vrot.slane %v728_v13, 7  ;;  %v854_v19 = vrot.slane %v731_v14, 1  ;;  %v597_v47 = vpack.c.bf16 %v565_v21, %v565_v21  ;;  %1351 = vmatpush.bf16.msrb.mxu3 %v3220_v10 }
 0x130   : > { %v733_v22 = vor.u32 %v731_v14, %v730_v16  ;;  %v3941_v24 = vor.u32 %v854_v19, %v728_v13  ;;  %v661_v34 = vunpack.c.l.b16 %v597_v47 }
 0x131   : > { %v502_v27 = vpop.f32.mrf.mxu0 }
 0x132   : > { %v503_v29 = vadd.f32 %v3809_v62, %v502_v27  ;;  %v3946_v31 = vsel %vm3825_vm2, 0, %v733_v22  ;;  %1352 = vmatpush.bf16.msrb.mxu3 %v3219_v15 }
 0x133   : > { %4900 = vst [vmem:[#allocation28_spill] sm:$0xff] %v3946_v31  ;;  %1198 = vmatmul.bf16.gmra.mxu1 %v3946_v31 }
 0x134   : > { %v566_v32 = vmax.f32 %v503_v29, 0.0  ;;  %v3218_v29 = vld [vmem:[#allocation7 + $0x150] sm:$0xff] }
 0x136   : > { %v598_v33 = vpack.c.bf16 %v566_v32, %v566_v32  ;;  %1353 = vmatpush.bf16.msrb.mxu3 %v3218_v29 }
 0x138   : > { %v662_v36 = vunpack.c.l.b16 %v598_v33 }
 0x139   : > { %v505_v40 = vpop.f32.mrf.mxu0  ;;  %1327 = vmatmul.bf16.vlgmr.msra.gmra.mxu3 %v3829_v39 }
 0x13a   : > { %v3950_v41 = vpack.c.b16 %v662_v36, %v661_v34  ;;  %v506_v43 = vadd.f32 %v3809_v62, %v505_v40  ;;  %v3186_v36 = vld [vmem:[#allocation7 + $0x50] sm:$0xff]  ;;  %1354 = vmatpush.bf16.msrb.mxu3 %v3217_v38  ;;  %v3185_v38 = vld [vmem:[#allocation7 + $0x48] sm:$0xff] }
 0x13b   : > { %1675 = vmatpush.bf16.msrb.mxu1 %v3186_v36 }
 0x13c   : > { %1292 = vmatmul.bf16.gmra.mxu2 %v3950_v41  ;;  %1599 = vmatmul.bf16.gmra.mxu0 %v3866_v26  ;;  %v735_v50 = vshrl.u32 %v3950_v41, 16  ;;  %v738_v51 = vshll.u32 %v3950_v41, 16  ;;  %v567_v57 = vmax.f32 %v506_v43, 0.0 }
 0x13e   : > { %v737_v54 = vrot.slane %v735_v50, 7  ;;  %v856_v55 = vrot.slane %v738_v51, 1  ;;  %v599_v4 = vpack.c.bf16 %v567_v57, %v567_v57 }
 0x13f   : > { %1676 = vmatpush.bf16.msrb.mxu1 %v3185_v38 }
 0x140   : > { %v740_v58 = vor.u32 %v738_v51, %v737_v54  ;;  %v3957_v60 = vor.u32 %v856_v55, %v735_v50  ;;  %v663_v13 = vunpack.c.l.b16 %v599_v4  ;;  %v3216_v54 = vld [vmem:[#allocation7 + $0x140] sm:$0xff] }
 0x141   : > { %v507_v61 = vpop.f32.mrf.mxu0  ;;  %1355 = vmatpush.bf16.msrb.mxu3 %v3216_v54 }
 0x142   : > { %v508_v1 = vadd.f32 %v3809_v62, %v507_v61  ;;  %v3962_v2 = vsel %vm3825_vm2, 0, %v740_v58 }
 0x143   : > { %4901 = vst [vmem:[#allocation29_spill] sm:$0xff] %v3962_v2  ;;  %1203 = vmatmul.bf16.gmra.mxu1 %v3962_v2 }
 0x144   : > { %v568_v6 = vmax.f32 %v508_v1, 0.0 }
 0x146   : > { %v600_v12 = vpack.c.bf16 %v568_v6, %v568_v6 }
 0x148   : > { %v664_v14 = vunpack.c.l.b16 %v600_v12 }
 0x149   : > { %v510_v16 = vpop.f32.mrf.mxu0  ;;  %1332 = vmatmul.bf16.gmra.mxu3 %v3858_v18 }
 0x14a   : > { %v3966_v19 = vpack.c.b16 %v664_v14, %v663_v13  ;;  %v511_v21 = vadd.f32 %v3809_v62, %v510_v16 }
 0x14c   : > { %1297 = vmatmul.bf16.gmra.mxu2 %v3966_v19  ;;  %1604 = vmatmul.bf16.gmra.mxu0 %v3895_v9  ;;  %v742_v22 = vshrl.u32 %v3966_v19, 16  ;;  %v745_v27 = vshll.u32 %v3966_v19, 16  ;;  %v569_v33 = vmax.f32 %v511_v21, 0.0 }
 0x14e   : > { %v744_v47 = vrot.slane %v742_v22, 7  ;;  %v858_v32 = vrot.slane %v745_v27, 1  ;;  %v601_v51 = vpack.c.bf16 %v569_v33, %v569_v33 }
 0x150   : > { %v747_v34 = vor.u32 %v745_v27, %v744_v47  ;;  %v3973_v40 = vor.u32 %v858_v32, %v742_v22  ;;  %v665_v57 = vunpack.c.l.b16 %v601_v51 }
 0x151   : > { %v512_v42 = vpop.f32.mrf.mxu0 }
 0x152   : > { %v513_v43 = vadd.f32 %v3809_v62, %v512_v42  ;;  %v3978_v50 = vsel %vm3825_vm2, 0, %v747_v34  ;;  %v3199_v42 = vld [vmem:[#allocation7 + $0xb8] sm:$0xff] }
 0x153   : > { %4902 = vst [vmem:[#allocation30_spill] sm:$0xff] %v3978_v50  ;;  %1208 = vmatmul.bf16.gmra.mxu1 %v3978_v50  ;;  %1759 = vmatpush.bf16.msrb.mxu2 %v3199_v42  ;;  %v4022_v42 = vsel %vm4015_vm5, %v3832_v45, 0 }
 0x154   : > { %v570_v52 = vmax.f32 %v513_v43, 0.0 }
 0x156   : > { %v602_v55 = vpack.c.bf16 %v570_v52, %v570_v52 }
 0x158   : > { %v666_v58 = vunpack.c.l.b16 %v602_v55 }
 0x159   : > { %v515_v59 = vpop.f32.mrf.mxu0  ;;  %1337 = vmatmul.bf16.gmra.mxu3 %v3887_v0 }
 0x15a   : > { %v3982_v61 = vpack.c.b16 %v666_v58, %v665_v57  ;;  %v516_v1 = vadd.f32 %v3809_v62, %v515_v59 }
 0x15c   : > { %1302 = vmatmul.bf16.gmra.mxu2 %v3982_v61  ;;  %1609 = vmatmul.bf16.gmra.mxu0 %v3922_v56  ;;  %v749_v4 = vshrl.u32 %v3982_v61, 16  ;;  %v752_v6 = vshll.u32 %v3982_v61, 16  ;;  %v571_v13 = vmax.f32 %v516_v1, 0.0 }
 0x15e   : > { %v751_v10 = vrot.slane %v749_v4, 7  ;;  %v860_v12 = vrot.slane %v752_v6, 1  ;;  %v603_v27 = vpack.c.bf16 %v571_v13, %v571_v13 }
 0x160   : > { %v754_v14 = vor.u32 %v752_v6, %v751_v10  ;;  %v3989_v15 = vor.u32 %v860_v12, %v749_v4  ;;  %v667_v32 = vunpack.c.l.b16 %v603_v27  ;;  %v3198_v4 = vld [vmem:[#allocation7 + $0xb0] sm:$0xff]  ;;  %v3197_v27 = vld [vmem:[#allocation7 + $0xa8] sm:$0xff] }
 0x161   : > { %v517_v16 = vpop.f32.mrf.mxu0  ;;  %1760 = vmatpush.bf16.msrb.mxu2 %v3198_v4 }
 0x162   : > { %v518_v21 = vadd.f32 %v3809_v62, %v517_v16  ;;  %v3994_v22 = vsel %vm3825_vm2, 0, %v754_v14 }
 0x163   : > { %4903 = vst [vmem:[#allocation31_spill] sm:$0xff] %v3994_v22  ;;  %1213 = vmatmul.bf16.gmra.mxu1 %v3994_v22 }
 0x164   : > { %v572_v29 = vmax.f32 %v518_v21, 0.0 }
 0x165   : > { %1761 = vmatpush.bf16.msrb.mxu2 %v3197_v27 }
 0x166   : > { %v604_v47 = vpack.c.bf16 %v572_v29, %v572_v29 }
 0x168   : > { %v668_v33 = vunpack.c.l.b16 %v604_v47 }
 0x169   : > { %v520_v34 = vpop.f32.mrf.mxu0  ;;  %1342 = vmatmul.bf16.gmra.mxu3 %v3915_v48 }
 0x16a   : > { %v3998_v36 = vpack.c.b16 %v668_v33, %v667_v32  ;;  %v521_v43 = vadd.f32 %v3809_v62, %v520_v34 }
 0x16c   : > { %1307 = vmatmul.bf16.gmra.mxu2 %v3998_v36  ;;  %1614 = vmatmul.bf16.gmra.mxu0 %v3946_v31  ;;  %v756_v51 = vshrl.u32 %v3998_v36, 16  ;;  %v759_v52 = vshll.u32 %v3998_v36, 16  ;;  %v573_v58 = vmax.f32 %v521_v43, 0.0  ;;  %v3196_v43 = vld [vmem:[#allocation7 + $0xa0] sm:$0xff] }
 0x16d   : > { %1762 = vmatpush.bf16.msrb.mxu2 %v3196_v43 }
 0x16e   : > { %v758_v54 = vrot.slane %v756_v51, 7  ;;  %v862_v55 = vrot.slane %v759_v52, 1  ;;  %v605_v16 = vpack.c.bf16 %v573_v58, %v573_v58 }
 0x16f   : > { %v1268_v57 = vpop.f32.mrf.mxu2 }
 0x170   : > { %v1179_v59 = vpop.f32.mrf.mxu1  ;;  %v761_v1 = vor.u32 %v759_v52, %v758_v54  ;;  %v4005_v6 = vor.u32 %v862_v55, %v756_v51  ;;  %v669_v33 = vunpack.c.l.b16 %v605_v16  ;;  %v3184_v55 = vld [vmem:[#allocation7 + $0x40] sm:$0xff] }
 0x171   : > { %v4007_v10 = vadd.f32 %v1268_v57, %v1179_v59  ;;  %v522_v12 = vpop.f32.mrf.mxu0  ;;  %1677 = vmatpush.bf16.msrb.mxu1 %v3184_v55 }
 0x172   : > { %v523_v13 = vadd.f32 %v3809_v62, %v522_v12  ;;  %v4012_v14 = vsel %vm3825_vm2, 0, %v761_v1  ;;  %v3195_v1 = vld [vmem:[#allocation7 + $0x98] sm:$0xff] }
 0x173   : > { %4904 = vst [vmem:[#allocation32_spill] sm:$0xff] %v4012_v14  ;;  %1218 = vmatmul.bf16.gmra.mxu1 %v4012_v14  ;;  %1763 = vmatpush.bf16.msrb.mxu2 %v3195_v1 }
 0x174   : > { %v574_v21 = vmax.f32 %v523_v13, 0.0 }
 0x176   : > { %v606_v47 = vpack.c.bf16 %v574_v21, %v574_v21 }
 0x177   : > { %v1270_v32 = vpop.f32.mrf.mxu2 }
 0x178   : > { %v670_v34 = vunpack.c.l.b16 %v606_v47  ;;  %v1181_v38 = vpop.f32.mrf.mxu1  ;;  %v3194_v47 = vld [vmem:[#allocation7 + $0x90] sm:$0xff] }
 0x179   : > { %v4024_v51 = vadd.f32 %v1270_v32, %v1181_v38  ;;  %v525_v52 = vpop.f32.mrf.mxu0  ;;  %1356 = vmatmul.bf16.vlgmr.msrb.gmra.mxu3 %v4022_v42  ;;  %1764 = vmatpush.bf16.msrb.mxu2 %v3194_v47 }
 0x17a   : > { %v4027_v54 = vpack.c.b16 %v670_v34, %v669_v33  ;;  %v526_v57 = vadd.f32 %v3809_v62, %v525_v52 }
 0x17c   : > { %v4030_v58 = vpop.f32.mrf.mxu3  ;;  %1312 = vmatmul.bf16.gmra.mxu2 %v4027_v54  ;;  %1619 = vmatmul.bf16.gmra.mxu0 %v3962_v2  ;;  %v763_v45 = vshrl.u32 %v4027_v54, 16  ;;  %v766_v59 = vshll.u32 %v4027_v54, 16  ;;  %v575_v16 = vmax.f32 %v526_v57, 0.0  ;;  %v3247_v2 = vld [vmem:[#allocation7 + $0x238] sm:$0xff] }
 0x17d   : > { %2219 = vmatpush.bf16.msra.mxu1 %v3247_v2 }
 0x17e   : > { %v765_v4 = vrot.slane %v763_v45, 7  ;;  %v864_v12 = vrot.slane %v766_v59, 1  ;;  %v607_v52 = vpack.c.bf16 %v575_v16, %v575_v16  ;;  %v3231_v16 = vld [vmem:[#allocation7 + $0x1b8] sm:$0xff] }
 0x17f   : > { %v1273_v13 = vpop.f32.mrf.mxu2  ;;  %2041 = vmatpush.bf16.msra.mxu3 %v3231_v16 }
 0x180   : > { %v1184_v21 = vpop.f32.mrf.mxu1  ;;  %v768_v27 = vor.u32 %v766_v59, %v765_v4  ;;  %v4036_v32 = vor.u32 %v864_v12, %v763_v45  ;;  %v3193_v59 = vld [vmem:[#allocation7 + $0x88] sm:$0xff]  ;;  %v671_v4 = vunpack.c.l.b16 %v607_v52 }
 0x181   : > { %v4038_v33 = vadd.f32 %v1273_v13, %v1184_v21  ;;  %v527_v34 = vpop.f32.mrf.mxu0  ;;  %1765 = vmatpush.bf16.msrb.mxu2 %v3193_v59  ;;  %v4051_v21 = vsel %vm4015_vm5, %v3861_v23, 0 }
 0x182   : > { %v528_v38 = vadd.f32 %v3809_v62, %v527_v34  ;;  %v4043_v43 = vsel %vm3825_vm2, 0, %v768_v27  ;;  %4908 = vst [vmem:[#allocation34_spill] sm:$0xff] %v4051_v21  ;;  %v3192_v27 = vld [vmem:[#allocation7 + $0x80] sm:$0xff] }
 0x183   : > { %4907 = vst [vmem:[#allocation33_spill] sm:$0xff] %v4043_v43  ;;  %1223 = vmatmul.bf16.gmra.mxu1 %v4043_v43  ;;  %2042 = vmatpush.bf16.msra.mxu3 %v3230_v37 }
 0x184   : > { %v576_v55 = vmax.f32 %v528_v38, 0.0  ;;  %v4046_v57 = vpop.f32.mrf.mxu3 }
 0x185   : > { %1766 = vmatpush.bf16.msrb.mxu2 %v3192_v27 }
 0x186   : > { %v608_v1 = vpack.c.bf16 %v576_v55, %v576_v55 }
 0x187   : > { %v1275_v45 = vpop.f32.mrf.mxu2 }
 0x188   : > { %v672_v12 = vunpack.c.l.b16 %v608_v1  ;;  %v1186_v13 = vpop.f32.mrf.mxu1 }
 0x189   : > { %v4053_v47 = vadd.f32 %v1275_v45, %v1186_v13  ;;  %v530_v34 = vpop.f32.mrf.mxu0  ;;  %1361 = vmatmul.bf16.gmra.mxu3 %v4051_v21 }
 0x18a   : > { %v4056_v38 = vpack.c.b16 %v672_v12, %v671_v4  ;;  %v531_v52 = vadd.f32 %v3809_v62, %v530_v34 }
 0x18c   : > { %4909 = vst [vmem:[#allocation35_spill] sm:$0xff] %v4056_v38  ;;  %v4059_v55 = vpop.f32.mrf.mxu3  ;;  %1317 = vmatmul.bf16.gmra.mxu2 %v4056_v38  ;;  %1624 = vmatmul.bf16.gmra.mxu0 %v3978_v50  ;;  %v770_v23 = vshrl.u32 %v4056_v38, 16  ;;  %v773_v59 = vshll.u32 %v4056_v38, 16  ;;  %v577_v35 = vmax.f32 %v531_v52, 0.0 }
 0x18e   : > { %v772_v1 = vrot.slane %v770_v23, 7  ;;  %v866_v45 = vrot.slane %v773_v59, 1  ;;  %v609_v31 = vpack.c.bf16 %v577_v35, %v577_v35 }
 0x18f   : > { %v1278_v13 = vpop.f32.mrf.mxu2 }
 0x190   : > { %v1189_v4 = vpop.f32.mrf.mxu1  ;;  %v775_v12 = vor.u32 %v773_v59, %v772_v1  ;;  %v4065_v27 = vor.u32 %v866_v45, %v770_v23  ;;  %v673_v1 = vunpack.c.l.b16 %v609_v31 }
 0x191   : > { %v4067_v16 = vadd.f32 %v1278_v13, %v1189_v4  ;;  %v532_v34 = vpop.f32.mrf.mxu0 }
 0x192   : > { %v533_v48 = vadd.f32 %v3809_v62, %v532_v34  ;;  %v4072_v50 = vsel %vm3825_vm2, 0, %v775_v12  ;;  %v4080_v62 = vsel %vm4015_vm5, %v3890_v7, 0 }
 0x193   : > { %4910 = vst [vmem:[#allocation36_spill] sm:$0xff] %v4072_v50  ;;  %1228 = vmatmul.bf16.gmra.mxu1 %v4072_v50 }
 0x194   : > { %v578_v52 = vmax.f32 %v533_v48, 0.0  ;;  %v4075_v0 = vpop.f32.mrf.mxu3  ;;  %4911 = vst [vmem:[#allocation37_spill] sm:$0xff] %v4080_v62 }
 0x196   : > { %v610_v23 = vpack.c.bf16 %v578_v52, %v578_v52 }
 0x197   : > { %v1280_v59 = vpop.f32.mrf.mxu2 }
 0x198   : > { %v674_v45 = vunpack.c.l.b16 %v610_v23  ;;  %v1191_v13 = vpop.f32.mrf.mxu1 }
 0x199   : > { %v4082_v4 = vadd.f32 %v1280_v59, %v1191_v13  ;;  %1366 = vmatmul.bf16.gmra.mxu3 %v4080_v62  ;;  %v4085_v8 = vpop.f32.mrf.mxu0 }
 0x19a   : > { %v4087_v35 = vpack.c.b16 %v674_v45, %v673_v1 }
 0x19c   : > { %4912 = vst [vmem:[#allocation38_spill] sm:$0xff] %v4087_v35  ;;  %v4089_v48 = vpop.f32.mrf.mxu3  ;;  %1322 = vmatmul.bf16.gmra.mxu2 %v4087_v35  ;;  %1629 = vmatmul.bf16.gmra.mxu0 %v3994_v22  ;;  %v777_v31 = vshrl.u32 %v4087_v35, 16  ;;  %v780_v2 = vshll.u32 %v4087_v35, 16 }
 0x19e   : > { %v779_v7 = vrot.slane %v777_v31, 7  ;;  %v868_v12 = vrot.slane %v780_v2, 1 }
 0x19f   : > { %v1283_v34 = vpop.f32.mrf.mxu2 }
 0x1a0   : > { %v1194_v52 = vpop.f32.mrf.mxu1  ;;  %v782_v23 = vor.u32 %v780_v2, %v779_v7  ;;  %v4095_v59 = vor.u32 %v868_v12, %v777_v31  ;;  %v4111_v2 = vsel %vm4015_vm5, %v3917_v53, 0 }
 0x1a1   : > { %v4097_v13 = vadd.f32 %v1283_v34, %v1194_v52  ;;  %v4099_v1 = vpop.f32.mrf.mxu0  ;;  %4914 = vst [vmem:[#allocation40_spill] sm:$0xff] %v4111_v2  ;;  %v4915_v34 = vmov 0  }
 0x1a2   : > { %v4103_v45 = vsel %vm3825_vm2, 0, %v782_v23 }
 0x1a3   : > { %4913 = vst [vmem:[#allocation39_spill] sm:$0xff] %v4103_v45  ;;  %1233 = vmatmul.bf16.gmra.mxu1 %v4103_v45 }
 0x1a4   : > { %v4106_v22 = vpop.f32.mrf.mxu3 }
 0x1a7   : > { %v1285_v56 = vpop.f32.mrf.mxu2 }
 0x1a8   : > { %v1196_v18 = vpop.f32.mrf.mxu1 }
 0x1a9   : > { %v4113_v31 = vadd.f32 %v1285_v56, %v1196_v18  ;;  %1371 = vmatmul.bf16.gmra.mxu3 %v4111_v2  ;;  %v4116_v7 = vpop.f32.mrf.mxu0  ;;  %v3238_v18 = vld [vmem:[#allocation7 + $0x1f0] sm:$0xff] }
 0x1aa   : > { %2131 = vmatpush.bf16.msra.mxu0 %v3238_v18  ;;  %v3246_v56 = vld [vmem:[#allocation7 + $0x230] sm:$0xff] }
 0x1ab   : > { %2220 = vmatpush.bf16.msra.mxu1 %v3246_v56 }
 0x1ac   : > { %v4118_v12 = vpop.f32.mrf.mxu3  ;;  %1634 = vmatmul.bf16.gmra.mxu0 %v4012_v14  ;;  %1767 = vmatmul.bf16.vlgmr.msrb.gmra.mxu2 %v4915_v34  ;;  %v4132_v14 = vsel %vm4015_vm5, %v3941_v24, 0 }
 0x1ad   : > { %4916 = vst [vmem:[#allocation41_spill] sm:$0xff] %v4132_v14 }
 0x1af   : > { %v1288_v52 = vpop.f32.mrf.mxu2 }
 0x1b0   : > { %v1199_v23 = vpop.f32.mrf.mxu1 }
 0x1b1   : > { %v4122_v9 = vadd.f32 %v1288_v52, %v1199_v23  ;;  %v4124_v53 = vpop.f32.mrf.mxu0 }
 0x1b3   : > { %1678 = vmatmul.bf16.vlgmr.msrb.gmra.mxu1 %v4915_v34 }
 0x1b4   : > { %v4127_v39 = vpop.f32.mrf.mxu3 }
 0x1b7   : > { %v1290_v37 = vpop.f32.mrf.mxu2 }
 0x1b8   : > { %v1201_v26 = vpop.f32.mrf.mxu1 }
 0x1b9   : > { %v4134_v35 = vadd.f32 %v1290_v37, %v1201_v26  ;;  %1376 = vmatmul.bf16.gmra.mxu3 %v4132_v14  ;;  %v4137_v52 = vpop.f32.mrf.mxu0 }
 0x1bc   : > { %v1328_v23 = vpop.f32.mrf.mxu3  ;;  %1639 = vmatmul.bf16.gmra.mxu0 %v4043_v43  ;;  %1772 = vmatmul.bf16.gmra.mxu2 %v4022_v42  ;;  %v4155_v42 = vsel %vm4015_vm5, %v3957_v60, 0  ;;  %v3245_v43 = vld [vmem:[#allocation7 + $0x228] sm:$0xff] }
 0x1bd   : > { %v4142_v18 = vadd.f32 %v1328_v23, %v4030_v58  ;;  %4919 = vst [vmem:[#allocation44_spill] sm:$0xff] %v4155_v42  ;;  %v3229_v23 = vld [vmem:[#allocation7 + $0x1a8] sm:$0xff]  ;;  %2221 = vmatpush.bf16.msra.mxu1 %v3245_v43 }
 0x1be   : > { %2043 = vmatpush.bf16.msra.mxu3 %v3229_v23 }
 0x1bf   : > { %4917 = vst [vmem:[#allocation42_spill] sm:$0xff] %v4142_v18  ;;  %v1293_v56 = vpop.f32.mrf.mxu2 }
 0x1c0   : > { %v1204_v34 = vpop.f32.mrf.mxu1 }
 0x1c1   : > { %v4144_v20 = vadd.f32 %v1293_v56, %v1204_v34  ;;  %v4146_v24 = vpop.f32.mrf.mxu0 }
 0x1c3   : > { %1683 = vmatmul.bf16.gmra.mxu1 %v3817_v25 }
 0x1c4   : > { %v1330_v26 = vpop.f32.mrf.mxu3 }
 0x1c5   : > { %v4150_v37 = vadd.f32 %v1330_v26, %v4046_v57 }
 0x1c7   : > { %4918 = vst [vmem:[#allocation43_spill] sm:$0xff] %v4150_v37  ;;  %v1295_v38 = vpop.f32.mrf.mxu2 }
 0x1c8   : > { %v1206_v44 = vpop.f32.mrf.mxu1 }
 0x1c9   : > { %v4157_v58 = vadd.f32 %v1295_v38, %v1206_v44  ;;  %1381 = vmatmul.bf16.gmra.mxu3 %v4155_v42  ;;  %v4160_v34 = vpop.f32.mrf.mxu0  ;;  %v3237_v38 = vld [vmem:[#allocation7 + $0x1e8] sm:$0xff] }
 0x1ca   : > { %2132 = vmatpush.bf16.msra.mxu0 %v3237_v38 }
 0x1cc   : > { %v1333_v25 = vpop.f32.mrf.mxu3  ;;  %1644 = vmatmul.bf16.gmra.mxu0 %v4072_v50  ;;  %1777 = vmatmul.bf16.gmra.mxu2 %v4051_v21 }
 0x1cd   : > { %v4165_v57 = vadd.f32 %v1333_v25, %v4059_v55  ;;  %v4178_v55 = vsel %vm4015_vm5, %v3973_v40, 0 }
 0x1ce   : > { %4922 = vst [vmem:[#allocation47_spill] sm:$0xff] %v4178_v55 }
 0x1cf   : > { %4920 = vst [vmem:[#allocation45_spill] sm:$0xff] %v4165_v57  ;;  %v1298_v56 = vpop.f32.mrf.mxu2 }
 0x1d0   : > { %v1209_v26 = vpop.f32.mrf.mxu1 }
 0x1d1   : > { %v4167_v60 = vadd.f32 %v1298_v56, %v1209_v26  ;;  %v4169_v44 = vpop.f32.mrf.mxu0 }
 0x1d3   : > { %1688 = vmatmul.bf16.gmra.mxu1 %v3850_v5 }
 0x1d4   : > { %v1335_v23 = vpop.f32.mrf.mxu3 }
 0x1d5   : > { %v4173_v37 = vadd.f32 %v1335_v23, %v4075_v0 }
 0x1d7   : > { %4921 = vst [vmem:[#allocation46_spill] sm:$0xff] %v4173_v37  ;;  %v1300_v50 = vpop.f32.mrf.mxu2 }
 0x1d8   : > { %v1211_v18 = vpop.f32.mrf.mxu1 }
 0x1d9   : > { %v4180_v25 = vadd.f32 %v1300_v50, %v1211_v18  ;;  %1386 = vmatmul.bf16.gmra.mxu3 %v4178_v55  ;;  %v4183_v56 = vpop.f32.mrf.mxu0 }
 0x1dc   : > { %v1338_v26 = vpop.f32.mrf.mxu3  ;;  %1649 = vmatmul.bf16.gmra.mxu0 %v4103_v45  ;;  %1782 = vmatmul.bf16.gmra.mxu2 %v4080_v62  ;;  %v4201_v45 = vsel %vm4015_vm5, %v3989_v15, 0 }
 0x1dd   : > { %v4188_v0 = vadd.f32 %v1338_v26, %v4089_v48  ;;  %4925 = vst [vmem:[#allocation50_spill] sm:$0xff] %v4201_v45  ;;  %v3236_v48 = vld [vmem:[#allocation7 + $0x1e0] sm:$0xff] }
 0x1de   : > { %2133 = vmatpush.bf16.msra.mxu0 %v3236_v48  ;;  %v3244_v48 = vld [vmem:[#allocation7 + $0x220] sm:$0xff] }
 0x1df   : > { %4923 = vst [vmem:[#allocation48_spill] sm:$0xff] %v4188_v0  ;;  %v1303_v43 = vpop.f32.mrf.mxu2  ;;  %2222 = vmatpush.bf16.msra.mxu1 %v3244_v48 }
 0x1e0   : > { %v1214_v38 = vpop.f32.mrf.mxu1 }
 0x1e1   : > { %v4190_v23 = vadd.f32 %v1303_v43, %v1214_v38  ;;  %v4192_v40 = vpop.f32.mrf.mxu0  ;;  %v3228_v43 = vld [vmem:[#allocation7 + $0x1a0] sm:$0xff] }
 0x1e2   : > { %2044 = vmatpush.bf16.msra.mxu3 %v3228_v43 }
 0x1e3   : > { %1693 = vmatmul.bf16.gmra.mxu1 %v3879_v49 }
 0x1e4   : > { %v1340_v50 = vpop.f32.mrf.mxu3 }
 0x1e5   : > { %v4196_v18 = vadd.f32 %v1340_v50, %v4106_v22  ;;  %v3235_v22 = vld [vmem:[#allocation7 + $0x1d8] sm:$0xff] }
 0x1e6   : > { %2134 = vmatpush.bf16.msra.mxu0 %v3235_v22  ;;  %v4224_v22 = vsel %vm4015_vm5, %v4005_v6, 0 }
 0x1e7   : > { %4924 = vst [vmem:[#allocation49_spill] sm:$0xff] %v4196_v18  ;;  %v1305_v37 = vpop.f32.mrf.mxu2 }
 0x1e8   : > { %v1216_v57 = vpop.f32.mrf.mxu1 }
 0x1e9   : > { %v4203_v26 = vadd.f32 %v1305_v37, %v1216_v57  ;;  %1391 = vmatmul.bf16.gmra.mxu3 %v4201_v45  ;;  %v4206_v38 = vpop.f32.mrf.mxu0  ;;  %v3234_v57 = vld [vmem:[#allocation7 + $0x1d0] sm:$0xff] }
 0x1ea   : > { %2135 = vmatpush.bf16.msra.mxu0 %v3234_v57 }
 0x1ec   : > { %v1343_v0 = vpop.f32.mrf.mxu3  ;;  %1654 = vmatmul.bf16.gmra.mxu0 %v3847_v3  ;;  %1787 = vmatmul.bf16.gmra.mxu2 %v4111_v2  ;;  %v3233_v3 = vld [vmem:[#allocation7 + $0x1c8] sm:$0xff] }
 0x1ed   : > { %v4211_v50 = vadd.f32 %v1343_v0, %v4118_v12 }
 0x1ee   : > { %2136 = vmatpush.bf16.msra.mxu0 %v3233_v3 }
 0x1ef   : > { %4926 = vst [vmem:[#allocation51_spill] sm:$0xff] %v4211_v50  ;;  %v1308_v15 = vpop.f32.mrf.mxu2 }
 0x1f0   : > { %v1219_v37 = vpop.f32.mrf.mxu1 }
 0x1f1   : > { %v4213_v18 = vadd.f32 %v1308_v15, %v1219_v37  ;;  %v4216_v43 = vpop.f32.mrf.mxu0  ;;  %v3232_v15 = vld [vmem:[#allocation7 + $0x1c0] sm:$0xff] }
 0x1f2   : > { %2137 = vmatpush.bf16.msra.mxu0 %v3232_v15 }
 0x1f3   : > { %1698 = vmatmul.bf16.gmra.mxu1 %v3906_v30 }
 0x1f4   : > { %v1345_v62 = vpop.f32.mrf.mxu3 }
 0x1f5   : > { %v4219_v2 = vadd.f32 %v1345_v62, %v4127_v39 }
 0x1f7   : > { %4927 = vst [vmem:[#allocation52_spill] sm:$0xff] %v4219_v2  ;;  %v1310_v12 = vpop.f32.mrf.mxu2 }
 0x1f8   : > { %v1221_v0 = vpop.f32.mrf.mxu1 }
 0x1f9   : > { %v4226_v37 = vadd.f32 %v1310_v12, %v1221_v0  ;;  %1396 = vmatmul.bf16.gmra.mxu3 %v4224_v22  ;;  %v4232_v3 = vpop.f32.mrf.mxu0 }
 0x1fc   : > { %v1357_v57 = vpop.f32.mrf.mxu3  ;;  %1659 = vmatmul.bf16.gmra.mxu0 %v3876_v46  ;;  %1792 = vmatmul.bf16.gmra.mxu2 %v4132_v14 }
 0x1fd   : > { %v1358_v39 = vadd.f32 %v1357_v57, %v4007_v10  ;;  %v4245_v10 = vsel %vm4015_vm5, %v4036_v32, 0 }
 0x1ff   : > { %v1313_v62 = vpop.f32.mrf.mxu2 }
 0x200   : > { %v1224_v48 = vpop.f32.mrf.mxu1 }
 0x201   : > { %v4234_v2 = vadd.f32 %v1313_v62, %v1224_v48  ;;  %v4240_v15 = vpop.f32.mrf.mxu0  ;;  %v3227_v62 = vld [vmem:[#allocation7 + $0x198] sm:$0xff] }
 0x202   : > { %2045 = vmatpush.bf16.msra.mxu3 %v3227_v62 }
 0x203   : > { %1703 = vmatmul.bf16.gmra.mxu1 %v3932_v11 }
 0x204   : > { %v1359_v6 = vpop.f32.mrf.mxu3 }
 0x205   : > { %v4238_v12 = vadd.f32 %v1359_v6, %v4024_v51 }
 0x207   : > { %v1315_v0 = vpop.f32.mrf.mxu2 }
 0x208   : > { %v1226_v46 = vpop.f32.mrf.mxu1 }
 0x209   : > { %v4247_v57 = vadd.f32 %v1315_v0, %v1226_v46  ;;  %1401 = vmatmul.bf16.gmra.mxu3 %v4245_v10  ;;  %v4257_v32 = vpop.f32.mrf.mxu0  ;;  %v3243_v46 = vld [vmem:[#allocation7 + $0x218] sm:$0xff] }
 0x20a   : > { %2223 = vmatpush.bf16.msra.mxu1 %v3243_v46 }
 0x20c   : > { %v1362_v48 = vpop.f32.mrf.mxu3  ;;  %1664 = vmatmul.bf16.gmra.mxu0 %v3903_v28  ;;  %1797 = vmatmul.bf16.gmra.mxu2 %v4155_v42 }
 0x20d   : > { %v4253_v51 = vadd.f32 %v1362_v48, %v4038_v33  ;;  %v4266_v33 = vsel %vm4015_vm5, %v4065_v27, 0 }
 0x20f   : > { %v1318_v6 = vpop.f32.mrf.mxu2 }
 0x210   : > { %v1229_v50 = vpop.f32.mrf.mxu1 }
 0x211   : > { %v4255_v14 = vadd.f32 %v1318_v6, %v1229_v50  ;;  %v4271_v50 = vpop.f32.mrf.mxu0 }
 0x212   : > { %4929 = vst [vmem:[#allocation54_spill] sm:$0xff] %v4271_v50 }
 0x213   : > { %1708 = vmatmul.bf16.gmra.mxu1 %v3950_v41 }
 0x214   : > { %v1364_v0 = vpop.f32.mrf.mxu3 }
 0x215   : > { %v4261_v62 = vadd.f32 %v1364_v0, %v4053_v47 }
 0x217   : > { %v1320_v28 = vpop.f32.mrf.mxu2 }
 0x218   : > { %v1231_v21 = vpop.f32.mrf.mxu1 }
 0x219   : > { %v4268_v48 = vadd.f32 %v1320_v28, %v1231_v21  ;;  %1406 = vmatmul.bf16.gmra.mxu3 %v4266_v33  ;;  %v3255_v28 = vld [vmem:[#allocation8 + $0x38] sm:$0xff]  ;;  %v4284_v50 = vpop.f32.mrf.mxu0 }
 0x21a   : > { %2492 = vmatpush.bf16.msra.mxu2 %v3255_v28  ;;  %4930 = vst [vmem:[#allocation55_spill] sm:$0xff] %v4284_v50  ;;  %v1591_v28 = vadd.f32 %v4085_v8, %v1358_v39  ;;  %v4313_v8 = vsel %vm4015_vm5, %v3856_v17, 0  ;;  %v1596_v17 = vadd.f32 %v4116_v7, %v4253_v51  ;;  %v4340_v7 = vsel %vm4015_vm5, %v3885_v63, 0 }
 0x21b   : > { %4928 = vst [vmem:[#allocation53_spill] sm:$0xff] %v4268_v48 }
 0x21c   : > { %v1367_v6 = vpop.f32.mrf.mxu3  ;;  %1802 = vmatmul.bf16.gmra.mxu2 %v4178_v55  ;;  %2138 = vmatmul.bf16.vlgmr.msra.gmra.mxu0 %v3850_v5  ;;  %v4289_v5 = vsel %vm4015_vm5, %v4095_v59, 0 }
 0x21d   : > { %v4276_v47 = vadd.f32 %v1367_v6, %v4067_v16  ;;  %v3226_v6 = vld [vmem:[#allocation7 + $0x190] sm:$0xff] }
 0x21e   : > { %2046 = vmatpush.bf16.msra.mxu3 %v3226_v6 }
 0x21f   : > { %v1323_v46 = vpop.f32.mrf.mxu2  ;;  %v1601_v63 = vadd.f32 %v4137_v52, %v4276_v47  ;;  %v4932_v47 = vld [vmem:[#allocation23_spill] sm:$0xff] }
 0x220   : > { %v1234_v0 = vpop.f32.mrf.mxu1 }
 0x221   : > { %v4278_v42 = vadd.f32 %v1323_v46, %v1234_v0 }
 0x223   : > { %1713 = vmatmul.bf16.gmra.mxu1 %v3966_v19 }
 0x224   : > { %v1369_v21 = vpop.f32.mrf.mxu3 }
 0x225   : > { %v4282_v27 = vadd.f32 %v1369_v21, %v4082_v4  ;;  %v4300_v21 = vpop.f32.mrf.mxu0 }
 0x227   : > { %v1325_v55 = vpop.f32.mrf.mxu2 }
 0x228   : > { %v1236_v48 = vpop.f32.mrf.mxu1 }
 0x229   : > { %v4291_v16 = vadd.f32 %v1325_v55, %v1236_v48  ;;  %1411 = vmatmul.bf16.gmra.mxu3 %v4289_v5 }
 0x22b   : > { %4931 = vst [vmem:[#allocation56_spill] sm:$0xff] %v4291_v16  ;;  %v3242_v16 = vld [vmem:[#allocation7 + $0x210] sm:$0xff] }
 0x22c   : > { %v1372_v46 = vpop.f32.mrf.mxu3  ;;  %1807 = vmatmul.bf16.gmra.mxu2 %v4201_v45  ;;  %2143 = vmatmul.bf16.gmra.mxu0 %v3879_v49 }
 0x22d   : > { %v4297_v4 = vadd.f32 %v1372_v46, %v4097_v13  ;;  %2224 = vmatpush.bf16.msra.mxu1 %v3242_v16  ;;  %v1593_v13 = vadd.f32 %v4099_v1, %v4238_v12  ;;  %v4316_v46 = vpop.f32.mrf.mxu0 }
 0x22f   : > { %v1768_v0 = vpop.f32.mrf.mxu2 }
 0x230   : > { %v1679_v59 = vpop.f32.mrf.mxu1 }
 0x231   : > { %v1680_v55 = vadd.f32 %v1679_v59, %v1591_v28  ;;  %v3254_v59 = vld [vmem:[#allocation8 + $0x30] sm:$0xff] }
 0x232   : > { %2493 = vmatpush.bf16.msra.mxu2 %v3254_v59  ;;  %v3241_v59 = vld [vmem:[#allocation7 + $0x208] sm:$0xff] }
 0x233   : > { %v4302_v48 = vadd.f32 %v1768_v0, %v1680_v55  ;;  %1718 = vmatmul.bf16.gmra.mxu1 %v3982_v61 }
 0x234   : > { %v1374_v50 = vpop.f32.mrf.mxu3  ;;  %2225 = vmatpush.bf16.msra.mxu1 %v3241_v59 }
 0x235   : > { %v4306_v45 = vadd.f32 %v1374_v50, %v4113_v31  ;;  %v4330_v55 = vpop.f32.mrf.mxu0 }
 0x237   : > { %v1770_v49 = vpop.f32.mrf.mxu2 }
 0x238   : > { %v1681_v6 = vpop.f32.mrf.mxu1 }
 0x239   : > { %v1682_v39 = vadd.f32 %v1681_v6, %v1593_v13  ;;  %1416 = vmatmul.bf16.gmra.mxu3 %v4313_v8 }
 0x23b   : > { %v4318_v0 = vadd.f32 %v1770_v49, %v1682_v39 }
 0x23c   : > { %v1377_v31 = vpop.f32.mrf.mxu3  ;;  %1812 = vmatmul.bf16.gmra.mxu2 %v4224_v22  ;;  %2148 = vmatmul.bf16.gmra.mxu0 %v3906_v30  ;;  %v1598_v30 = vadd.f32 %v4124_v53, %v4261_v62 }
 0x23d   : > { %v4323_v1 = vadd.f32 %v1377_v31, %v4122_v9  ;;  %v3225_v31 = vld [vmem:[#allocation7 + $0x188] sm:$0xff]  ;;  %v4350_v53 = vpop.f32.mrf.mxu0 }
 0x23e   : > { %2047 = vmatpush.bf16.msra.mxu3 %v3225_v31 }
 0x23f   : > { %v1773_v12 = vpop.f32.mrf.mxu2  ;;  %v1611_v29 = vadd.f32 %v4183_v56, %v4323_v1 }
 0x240   : > { %v1684_v50 = vpop.f32.mrf.mxu1 }
 0x241   : > { %v1685_v16 = vadd.f32 %v1684_v50, %v1596_v17 }
 0x243   : > { %v4327_v28 = vadd.f32 %v1773_v12, %v1685_v16  ;;  %1723 = vmatmul.bf16.gmra.mxu1 %v3998_v36 }
 0x244   : > { %v1379_v49 = vpop.f32.mrf.mxu3 }
 0x245   : > { %v4333_v13 = vadd.f32 %v1379_v49, %v4134_v35 }
 0x247   : > { %v1775_v9 = vpop.f32.mrf.mxu2 }
 0x248   : > { %v1686_v6 = vpop.f32.mrf.mxu1 }
 0x249   : > { %v1687_v51 = vadd.f32 %v1686_v6, %v1598_v30  ;;  %1421 = vmatmul.bf16.gmra.mxu3 %v4340_v7  ;;  %v1603_v30 = vadd.f32 %v4146_v24, %v4282_v27  ;;  %v4362_v6 = vpop.f32.mrf.mxu0 }
 0x24b   : > { %v4343_v39 = vadd.f32 %v1775_v9, %v1687_v51  ;;  %v4367_v51 = vsel %vm4015_vm5, %v4932_v47, 0 }
 0x24c   : > { %v1382_v12 = vpop.f32.mrf.mxu3  ;;  %1817 = vmatmul.bf16.gmra.mxu2 %v4245_v10  ;;  %2153 = vmatmul.bf16.gmra.mxu0 %v3932_v11 }
 0x24d   : > { %v4348_v35 = vadd.f32 %v1382_v12, %v4144_v20  ;;  %v3224_v20 = vld [vmem:[#allocation7 + $0x180] sm:$0xff] }
 0x24e   : > { %2048 = vmatpush.bf16.msra.mxu3 %v3224_v20  ;;  %v3253_v20 = vld [vmem:[#allocation8 + $0x28] sm:$0xff] }
 0x24f   : > { %v1778_v62 = vpop.f32.mrf.mxu2  ;;  %2494 = vmatpush.bf16.msra.mxu2 %v3253_v20  ;;  %v3240_v20 = vld [vmem:[#allocation7 + $0x200] sm:$0xff] }
 0x250   : > { %v1689_v17 = vpop.f32.mrf.mxu1  ;;  %2226 = vmatpush.bf16.msra.mxu1 %v3240_v20 }
 0x251   : > { %v1690_v50 = vadd.f32 %v1689_v17, %v1601_v63 }
 0x253   : > { %v4354_v16 = vadd.f32 %v1778_v62, %v1690_v50  ;;  %1728 = vmatmul.bf16.gmra.mxu1 %v4027_v54  ;;  %v1606_v62 = vadd.f32 %v4160_v34, %v4297_v4  ;;  %v4379_v50 = vpop.f32.mrf.mxu0  ;;  %v4934_v34 = vld [vmem:[#allocation27_spill] sm:$0xff] }
 0x254   : > { %v1384_v49 = vpop.f32.mrf.mxu3  ;;  %v4392_v4 = vsel %vm4015_vm5, %v4934_v34, 0 }
 0x255   : > { %v4358_v11 = vadd.f32 %v1384_v49, %v4157_v58  ;;  %v4933_v49 = vld [vmem:[#allocation35_spill] sm:$0xff] }
 0x257   : > { %v1780_v9 = vpop.f32.mrf.mxu2 }
 0x258   : > { %v1691_v52 = vpop.f32.mrf.mxu1 }
 0x259   : > { %v1692_v31 = vadd.f32 %v1691_v52, %v1603_v30  ;;  %1426 = vmatmul.bf16.gmra.mxu3 %v4367_v51 }
 0x25b   : > { %v4370_v58 = vadd.f32 %v1780_v9, %v1692_v31 }
 0x25c   : > { %v1387_v12 = vpop.f32.mrf.mxu3  ;;  %1822 = vmatmul.bf16.gmra.mxu2 %v4266_v33  ;;  %2158 = vmatmul.bf16.gmra.mxu0 %v3950_v41 }
 0x25d   : > { %v4375_v24 = vadd.f32 %v1387_v12, %v4167_v60  ;;  %v1608_v60 = vadd.f32 %v4169_v44, %v4306_v45  ;;  %v4397_v12 = vpop.f32.mrf.mxu0 }
 0x25f   : > { %v1783_v27 = vpop.f32.mrf.mxu2 }
 0x260   : > { %v1694_v63 = vpop.f32.mrf.mxu1 }
 0x261   : > { %v1695_v17 = vadd.f32 %v1694_v63, %v1606_v62 }
 0x263   : > { %v4381_v59 = vadd.f32 %v1783_v27, %v1695_v17  ;;  %1733 = vmatmul.bf16.gmra.mxu1 %v4933_v49  ;;  %v4935_v17 = vld [vmem:[#allocation38_spill] sm:$0xff] }
 0x264   : > { %v1389_v9 = vpop.f32.mrf.mxu3 }
 0x265   : > { %v4385_v30 = vadd.f32 %v1389_v9, %v4180_v25 }
 0x267   : > { %v1785_v41 = vpop.f32.mrf.mxu2 }
 0x268   : > { %v1696_v52 = vpop.f32.mrf.mxu1 }
 0x269   : > { %v1697_v47 = vadd.f32 %v1696_v52, %v1608_v60  ;;  %1431 = vmatmul.bf16.gmra.mxu3 %v4392_v4  ;;  %v4410_v60 = vpop.f32.mrf.mxu0  ;;  %v4936_v52 = vld [vmem:[#allocation18_spill] sm:$0xff] }
 0x26b   : > { %v4395_v31 = vadd.f32 %v1785_v41, %v1697_v47 }
 0x26c   : > { %v1392_v25 = vpop.f32.mrf.mxu3  ;;  %1827 = vmatmul.bf16.gmra.mxu2 %v4289_v5  ;;  %2163 = vmatmul.bf16.gmra.mxu0 %v3966_v19 }
 0x26d   : > { %v1393_v45 = vadd.f32 %v1392_v25, %v4190_v23  ;;  %v1613_v23 = vadd.f32 %v4192_v40, %v4333_v13  ;;  %v1616_v25 = vadd.f32 %v4206_v38, %v4348_v35  ;;  %v4938_v35 = vld [vmem:[#allocation21_spill] sm:$0xff] }
 0x26f   : > { %v1788_v44 = vpop.f32.mrf.mxu2 }
 0x270   : > { %v1699_v27 = vpop.f32.mrf.mxu1 }
 0x271   : > { %v1700_v62 = vadd.f32 %v1699_v27, %v1611_v29  ;;  %v4937_v27 = vld [vmem:[#allocation15_spill] sm:$0xff] }
 0x273   : > { %v4404_v63 = vadd.f32 %v1788_v44, %v1700_v62  ;;  %1738 = vmatmul.bf16.gmra.mxu1 %v4935_v17  ;;  %v4424_v44 = vpop.f32.mrf.mxu0  ;;  %v3252_v62 = vld [vmem:[#allocation8 + $0x20] sm:$0xff] }
 0x274   : > { %v1394_v9 = vpop.f32.mrf.mxu3  ;;  %2495 = vmatpush.bf16.msra.mxu2 %v3252_v62 }
 0x275   : > { %v4408_v41 = vadd.f32 %v1394_v9, %v4203_v26 }
 0x277   : > { %v4412_v19 = vpop.f32.mrf.mxu2 }
 0x278   : > { %v1701_v56 = vpop.f32.mrf.mxu1 }
 0x279   : > { %v4416_v1 = vadd.f32 %v1701_v56, %v1613_v23  ;;  %2049 = vmatmul.bf16.vlgmr.msra.gmra.mxu3 %v4936_v52 }
 0x27b   : > { %v4437_v56 = vpop.f32.mrf.mxu0 }
 0x27c   : > { %v1397_v34 = vpop.f32.mrf.mxu3  ;;  %1832 = vmatmul.bf16.gmra.mxu2 %v4313_v8  ;;  %2168 = vmatmul.bf16.gmra.mxu0 %v3982_v61 }
 0x27d   : > { %v1398_v26 = vadd.f32 %v1397_v34, %v4213_v18  ;;  %v1618_v18 = vadd.f32 %v4216_v43, %v4358_v11 }
 0x27f   : > { %v1793_v47 = vpop.f32.mrf.mxu2 }
 0x280   : > { %v1704_v29 = vpop.f32.mrf.mxu1 }
 0x281   : > { %v1705_v40 = vadd.f32 %v1704_v29, %v1616_v25  ;;  %v4939_v29 = vld [vmem:[#allocation17_spill] sm:$0xff] }
 0x283   : > { %v4426_v13 = vadd.f32 %v1793_v47, %v1705_v40  ;;  %1743 = vmatmul.bf16.gmra.mxu1 %v4937_v27  ;;  %v1621_v47 = vadd.f32 %v4232_v3, %v4375_v24  ;;  %v4447_v40 = vpop.f32.mrf.mxu0  ;;  %v4941_v3 = vld [vmem:[#allocation25_spill] sm:$0xff] }
 0x284   : > { %v1399_v20 = vpop.f32.mrf.mxu3 }
 0x285   : > { %v1400_v9 = vadd.f32 %v1399_v20, %v4226_v37 }
 0x287   : > { %v4430_v61 = vpop.f32.mrf.mxu2 }
 0x288   : > { %v1706_v23 = vpop.f32.mrf.mxu1 }
 0x289   : > { %v4434_v38 = vadd.f32 %v1706_v23, %v1618_v18  ;;  %2054 = vmatmul.bf16.gmra.mxu3 %v4938_v35 }
 0x28c   : > { %v1402_v52 = vpop.f32.mrf.mxu3  ;;  %1837 = vmatmul.bf16.gmra.mxu2 %v4340_v7  ;;  %2173 = vmatmul.bf16.gmra.mxu0 %v3998_v36  ;;  %v1623_v36 = vadd.f32 %v4240_v15, %v4385_v30  ;;  %v4943_v30 = vld [vmem:[#allocation20_spill] sm:$0xff] }
 0x28d   : > { %v1403_v37 = vadd.f32 %v1402_v52, %v4234_v2  ;;  %v4460_v52 = vpop.f32.mrf.mxu0 }
 0x28f   : > { %v1798_v34 = vpop.f32.mrf.mxu2 }
 0x290   : > { %v1709_v25 = vpop.f32.mrf.mxu1 }
 0x291   : > { %v1710_v43 = vadd.f32 %v1709_v25, %v1621_v47 }
 0x293   : > { %v4444_v11 = vadd.f32 %v1798_v34, %v1710_v43  ;;  %1748 = vmatmul.bf16.gmra.mxu1 %v4939_v29  ;;  %v1626_v34 = vadd.f32 %v4257_v32, %v1393_v45  ;;  %v3251_v43 = vld [vmem:[#allocation8 + $0x18] sm:$0xff]  ;;  %v4948_v45 = vld [vmem:[#allocation28_spill] sm:$0xff] }
 0x294   : > { %v1404_v62 = vpop.f32.mrf.mxu3  ;;  %2496 = vmatpush.bf16.msra.mxu2 %v3251_v43 }
 0x295   : > { %v1405_v20 = vadd.f32 %v1404_v62, %v4247_v57 }
 0x297   : > { %v4450_v18 = vpop.f32.mrf.mxu2 }
 0x298   : > { %4940 = vst [vmem:[#allocation23_spill] sm:$0xff] %v4450_v18  ;;  %v1711_v2 = vpop.f32.mrf.mxu1 }
 0x299   : > { %v4454_v23 = vadd.f32 %v1711_v2, %v1623_v36  ;;  %2059 = vmatmul.bf16.gmra.mxu3 %v4941_v3  ;;  %v4944_v36 = vld [vmem:[#allocation53_spill] sm:$0xff] }
 0x29c   : > { %v1407_v24 = vpop.f32.mrf.mxu3  ;;  %1842 = vmatmul.bf16.gmra.mxu2 %v4367_v51  ;;  %2178 = vmatmul.bf16.gmra.mxu0 %v4027_v54 }
 0x29d   : > { %v1408_v35 = vadd.f32 %v1407_v24, %v4255_v14  ;;  %v4946_v14 = vld [vmem:[#allocation54_spill] sm:$0xff]  ;;  %v4471_v24 = vpop.f32.mrf.mxu0 }
 0x29e   : > { %v1628_v54 = vadd.f32 %v4946_v14, %v4408_v41  ;;  %v4950_v14 = vld [vmem:[#allocation34_spill] sm:$0xff] }
 0x29f   : > { %v1803_v57 = vpop.f32.mrf.mxu2 }
 0x2a0   : > { %v1714_v47 = vpop.f32.mrf.mxu1 }
 0x2a1   : > { %v1715_v25 = vadd.f32 %v1714_v47, %v1626_v34 }
 0x2a3   : > { %v4463_v15 = vadd.f32 %v1803_v57, %v1715_v25  ;;  %1753 = vmatmul.bf16.gmra.mxu1 %v4943_v30  ;;  %v4949_v25 = vld [vmem:[#allocation55_spill] sm:$0xff] }
 0x2a4   : > { %v1409_v62 = vpop.f32.mrf.mxu3  ;;  %v1631_v43 = vadd.f32 %v4949_v25, %v1398_v26 }
 0x2a5   : > { %4942 = vst [vmem:[#allocation35_spill] sm:$0xff] %v4463_v15  ;;  %v1410_v2 = vadd.f32 %v1409_v62, %v4944_v36 }
 0x2a7   : > { %v4467_v3 = vpop.f32.mrf.mxu2 }
 0x2a8   : > { %4945 = vst [vmem:[#allocation27_spill] sm:$0xff] %v4467_v3  ;;  %v1716_v18 = vpop.f32.mrf.mxu1  ;;  %v4479_v3 = vpop.f32.mrf.mxu0 }
 0x2a9   : > { %v4473_v32 = vadd.f32 %v1716_v18, %v1628_v54  ;;  %2064 = vmatmul.bf16.gmra.mxu3 %v4948_v45  ;;  %v4951_v54 = vld [vmem:[#allocation56_spill] sm:$0xff] }
 0x2ab   : > { %4947 = vst [vmem:[#allocation38_spill] sm:$0xff] %v4473_v32 }
 0x2ac   : > { %v1412_v57 = vpop.f32.mrf.mxu3  ;;  %2183 = vmatmul.bf16.gmra.mxu0 %v4933_v49  ;;  %v1633_v49 = vadd.f32 %v4300_v21, %v1400_v9  ;;  %v4956_v21 = vld [vmem:[#allocation37_spill] sm:$0xff] }
 0x2ad   : > { %v1413_v34 = vadd.f32 %v1412_v57, %v4278_v42  ;;  %v4954_v57 = vld [vmem:[#allocation29_spill] sm:$0xff] }
 0x2ae   : > { %v3250_v9 = vld [vmem:[#allocation8 + $0x10] sm:$0xff] }
 0x2af   : > { %v1808_v47 = vpop.f32.mrf.mxu2  ;;  %2497 = vmatpush.bf16.msra.mxu2 %v3250_v9 }
 0x2b0   : > { %v1719_v62 = vpop.f32.mrf.mxu1  ;;  %v4491_v26 = vpop.f32.mrf.mxu0 }
 0x2b1   : > { %v1720_v36 = vadd.f32 %v1719_v62, %v1631_v43 }
 0x2b3   : > { %v4481_v41 = vadd.f32 %v1808_v47, %v1720_v36  ;;  %2227 = vmatmul.bf16.vlgmr.msra.gmra.mxu1 %v4950_v14  ;;  %v4955_v47 = vld [vmem:[#allocation42_spill] sm:$0xff]  ;;  %v1636_v36 = vadd.f32 %v4316_v46, %v1403_v37 }
 0x2b4   : > { %v1414_v18 = vpop.f32.mrf.mxu3  ;;  %v4959_v46 = vld [vmem:[#allocation30_spill] sm:$0xff] }
 0x2b5   : > { %v1415_v32 = vadd.f32 %v1414_v18, %v4951_v54 }
 0x2b7   : > { %v4485_v45 = vpop.f32.mrf.mxu2 }
 0x2b8   : > { %4952 = vst [vmem:[#allocation18_spill] sm:$0xff] %v4485_v45  ;;  %v1721_v15 = vpop.f32.mrf.mxu1  ;;  %v4500_v45 = vpop.f32.mrf.mxu0 }
 0x2b9   : > { %v4488_v42 = vadd.f32 %v1721_v15, %v1633_v49  ;;  %2069 = vmatmul.bf16.gmra.mxu3 %v4954_v57  ;;  %v4957_v49 = vld [vmem:[#allocation43_spill] sm:$0xff] }
 0x2bb   : > { %4953 = vst [vmem:[#allocation15_spill] sm:$0xff] %v4488_v42 }
 0x2bc   : > { %v1417_v25 = vpop.f32.mrf.mxu3  ;;  %2188 = vmatmul.bf16.gmra.mxu0 %v4935_v17  ;;  %v1638_v17 = vadd.f32 %v4330_v55, %v1405_v20  ;;  %v4961_v55 = vld [vmem:[#allocation40_spill] sm:$0xff] }
 0x2bd   : > { %v1418_v43 = vadd.f32 %v1417_v25, %v4955_v47 }
 0x2bf   : > { %v1813_v62 = vpop.f32.mrf.mxu2 }
 0x2c0   : > { %v1724_v14 = vpop.f32.mrf.mxu1 }
 0x2c1   : > { %v1725_v18 = vadd.f32 %v1724_v14, %v1636_v36 }
 0x2c3   : > { %v4496_v54 = vadd.f32 %v1813_v62, %v1725_v18  ;;  %2232 = vmatmul.bf16.gmra.mxu1 %v4956_v21  ;;  %v4960_v62 = vld [vmem:[#allocation45_spill] sm:$0xff]  ;;  %v1641_v18 = vadd.f32 %v4350_v53, %v1408_v35  ;;  %v4511_v21 = vpop.f32.mrf.mxu0 }
 0x2c4   : > { %v1419_v15 = vpop.f32.mrf.mxu3 }
 0x2c5   : > { %v1420_v57 = vadd.f32 %v1419_v15, %v4957_v49 }
 0x2c7   : > { %v4502_v42 = vpop.f32.mrf.mxu2 }
 0x2c8   : > { %4958 = vst [vmem:[#allocation21_spill] sm:$0xff] %v4502_v42  ;;  %v1726_v25 = vpop.f32.mrf.mxu1 }
 0x2c9   : > { %v4505_v47 = vadd.f32 %v1726_v25, %v1638_v17  ;;  %2074 = vmatmul.bf16.gmra.mxu3 %v4959_v46  ;;  %v4962_v17 = vld [vmem:[#allocation46_spill] sm:$0xff] }
 0x2cb   : > { %v4523_v53 = vpop.f32.mrf.mxu0 }
 0x2cc   : > { %v1422_v37 = vpop.f32.mrf.mxu3  ;;  %2193 = vmatmul.bf16.gmra.mxu0 %v4937_v27  ;;  %v1643_v27 = vadd.f32 %v4362_v6, %v1410_v2  ;;  %v4967_v6 = vld [vmem:[#allocation41_spill] sm:$0xff]  ;;  %v3249_v2 = vld [vmem:[#allocation8 + $0x8] sm:$0xff] }
 0x2cd   : > { %v1423_v36 = vadd.f32 %v1422_v37, %v4960_v62  ;;  %v4965_v62 = vld [vmem:[#allocation31_spill] sm:$0xff]  ;;  %2498 = vmatpush.bf16.msra.mxu2 %v3249_v2 }
 0x2cf   : > { %v1818_v14 = vpop.f32.mrf.mxu2 }
 0x2d0   : > { %v1729_v9 = vpop.f32.mrf.mxu1 }
 0x2d1   : > { %v1730_v15 = vadd.f32 %v1729_v9, %v1641_v18 }
 0x2d3   : > { %v4513_v49 = vadd.f32 %v1818_v14, %v1730_v15  ;;  %2237 = vmatmul.bf16.gmra.mxu1 %v4961_v55  ;;  %v4966_v14 = vld [vmem:[#allocation48_spill] sm:$0xff]  ;;  %v1646_v15 = vadd.f32 %v4379_v50, %v1413_v34 }
 0x2d4   : > { %v1424_v20 = vpop.f32.mrf.mxu3  ;;  %v4971_v50 = vld [vmem:[#allocation32_spill] sm:$0xff] }
 0x2d5   : > { %v1425_v25 = vadd.f32 %v1424_v20, %v4962_v17 }
 0x2d7   : > { %v4517_v46 = vpop.f32.mrf.mxu2 }
 0x2d8   : > { %4963 = vst [vmem:[#allocation17_spill] sm:$0xff] %v4517_v46  ;;  %v1731_v42 = vpop.f32.mrf.mxu1 }
 0x2d9   : > { %v4520_v37 = vadd.f32 %v1731_v42, %v1643_v27  ;;  %2079 = vmatmul.bf16.gmra.mxu3 %v4965_v62  ;;  %v4531_v42 = vpop.f32.mrf.mxu0  ;;  %v4968_v62 = vld [vmem:[#allocation49_spill] sm:$0xff] }
 0x2db   : > { %4964 = vst [vmem:[#allocation25_spill] sm:$0xff] %v4520_v37 }
 0x2dc   : > { %v1427_v35 = vpop.f32.mrf.mxu3  ;;  %2198 = vmatmul.bf16.gmra.mxu0 %v4939_v29  ;;  %v1648_v29 = vadd.f32 %v4397_v12, %v1415_v32  ;;  %v4973_v12 = vld [vmem:[#allocation44_spill] sm:$0xff] }
 0x2dd   : > { %v1428_v18 = vadd.f32 %v1427_v35, %v4966_v14 }
 0x2df   : > { %v1823_v9 = vpop.f32.mrf.mxu2 }
 0x2e0   : > { %v1734_v55 = vpop.f32.mrf.mxu1 }
 0x2e1   : > { %v1735_v20 = vadd.f32 %v1734_v55, %v1646_v15  ;;  %v4542_v55 = vpop.f32.mrf.mxu0 }
 0x2e3   : > { %v4528_v17 = vadd.f32 %v1823_v9, %v1735_v20  ;;  %2242 = vmatmul.bf16.gmra.mxu1 %v4967_v6  ;;  %v4972_v9 = vld [vmem:[#allocation51_spill] sm:$0xff]  ;;  %v1651_v6 = vadd.f32 %v4410_v60, %v1418_v43  ;;  %v4978_v43 = vld [vmem:[#allocation24_spill] sm:$0xff] }
 0x2e4   : > { %v1429_v27 = vpop.f32.mrf.mxu3 }
 0x2e5   : > { %v1430_v46 = vadd.f32 %v1429_v27, %v4968_v62 }
 0x2e7   : > { %v4534_v37 = vpop.f32.mrf.mxu2 }
 0x2e8   : > { %4969 = vst [vmem:[#allocation20_spill] sm:$0xff] %v4534_v37  ;;  %v1736_v35 = vpop.f32.mrf.mxu1 }
 0x2e9   : > { %v4537_v14 = vadd.f32 %v1736_v35, %v1648_v29  ;;  %2084 = vmatmul.bf16.gmra.mxu3 %v4971_v50  ;;  %v4974_v29 = vld [vmem:[#allocation52_spill] sm:$0xff]  ;;  %v4552_v37 = vpop.f32.mrf.mxu0 }
 0x2eb   : > { %4970 = vst [vmem:[#allocation53_spill] sm:$0xff] %v4537_v14  ;;  %v4977_v14 = vld [vmem:[#allocation33_spill] sm:$0xff] }
 0x2ec   : > { %v1432_v34 = vpop.f32.mrf.mxu3  ;;  %2203 = vmatmul.bf16.gmra.mxu0 %v4943_v30  ;;  %v1653_v30 = vadd.f32 %v4424_v44, %v1420_v57  ;;  %v4980_v44 = vld [vmem:[#allocation47_spill] sm:$0xff] }
 0x2ed   : > { %v1433_v15 = vadd.f32 %v1432_v34, %v4972_v9  ;;  %v3248_v57 = vld [vmem:[#allocation8] sm:$0xff] }
 0x2ee   : > { %2499 = vmatpush.bf16.msra.mxu2 %v3248_v57 }
 0x2ef   : > { %v1828_v20 = vpop.f32.mrf.mxu2 }
 0x2f0   : > { %v1739_v2 = vpop.f32.mrf.mxu1 }
 0x2f1   : > { %v1740_v27 = vadd.f32 %v1739_v2, %v1651_v6  ;;  %v1656_v6 = vadd.f32 %v4437_v56, %v1423_v36 }
 0x2f3   : > { %v4545_v62 = vadd.f32 %v1828_v20, %v1740_v27  ;;  %2247 = vmatmul.bf16.gmra.mxu1 %v4973_v12  ;;  %v4559_v12 = vpop.f32.mrf.mxu0 }
 0x2f4   : > { %v1434_v32 = vpop.f32.mrf.mxu3 }
 0x2f5   : > { %v1435_v35 = vadd.f32 %v1434_v32, %v4974_v29 }
 0x2f7   : > { %v4549_v50 = vpop.f32.mrf.mxu2 }
 0x2f8   : > { %4975 = vst [vmem:[#allocation54_spill] sm:$0xff] %v4549_v50  ;;  %v1741_v34 = vpop.f32.mrf.mxu1  ;;  %v4983_v50 = vld [vmem:[#allocation36_spill] sm:$0xff] }
 0x2f9   : > { %v4554_v9 = vadd.f32 %v1741_v34, %v1653_v30  ;;  %2089 = vmatmul.bf16.gmra.mxu3 %v4977_v14  ;;  %v1658_v14 = vadd.f32 %v4447_v40, %v1425_v25  ;;  %v1663_v25 = vadd.f32 %v4471_v24, %v1430_v46  ;;  %v1668_v24 = vadd.f32 %v4491_v26, %v1435_v35  ;;  %v4598_v26 = vld [vmem:[%s4837_s4] ss:$0 sm:$0xff] }
 0x2fb   : > { %4976 = vst [vmem:[#allocation28_spill] sm:$0xff] %v4554_v9  ;;  %v4570_v56 = vpop.f32.mrf.mxu0  ;;  %v1666_v9 = vadd.f32 %v4479_v3, %v1433_v15 }
 0x2fc   : > { %v2050_v60 = vpop.f32.mrf.mxu3  ;;  %2208 = vmatmul.bf16.gmra.mxu0 %v4978_v43 }
 0x2ff   : > { %v1833_v20 = vpop.f32.mrf.mxu2 }
 0x300   : > { %v1744_v2 = vpop.f32.mrf.mxu1 }
 0x301   : > { %v1745_v27 = vadd.f32 %v1744_v2, %v1656_v6  ;;  %v4984_v6 = vmov 0   ;;  %v1661_v2 = vadd.f32 %v4460_v52, %v1428_v18 }
 0x303   : > { %v4561_v32 = vadd.f32 %v1833_v20, %v1745_v27  ;;  %2252 = vmatmul.bf16.gmra.mxu1 %v4980_v44 }
 0x304   : > { %v2052_v29 = vpop.f32.mrf.mxu3 }
 0x305   : > { %4979 = vst [vmem:[#allocation55_spill] sm:$0xff] %v4561_v32 }
 0x307   : > { %v4564_v30 = vpop.f32.mrf.mxu2 }
 0x308   : > { %4981 = vst [vmem:[#allocation34_spill] sm:$0xff] %v4564_v30  ;;  %v1746_v34 = vpop.f32.mrf.mxu1  ;;  %v4985_v30 = vld [vmem:[#allocation50_spill] sm:$0xff] }
 0x309   : > { %v4567_v43 = vadd.f32 %v1746_v34, %v1658_v14  ;;  %2094 = vmatmul.bf16.gmra.mxu3 %v4983_v50 }
 0x30b   : > { %4982 = vst [vmem:[#allocation56_spill] sm:$0xff] %v4567_v43  ;;  %v4986_v43 = vld [vmem:[#allocation39_spill] sm:$0xff] }
 0x30c   : > { %v2055_v36 = vpop.f32.mrf.mxu3  ;;  %2213 = vmatmul.bf16.gmra.mxu0 %v4984_v6 }
 0x30f   : > { %v1838_v20 = vpop.f32.mrf.mxu2 }
 0x310   : > { %v1749_v27 = vpop.f32.mrf.mxu1 }
 0x311   : > { %v1750_v44 = vadd.f32 %v1749_v27, %v1661_v2 }
 0x313   : > { %v4574_v57 = vadd.f32 %v1838_v20, %v1750_v44  ;;  %2257 = vmatmul.bf16.gmra.mxu1 %v4985_v30  ;;  %v4987_v44 = vld [vmem:[#allocation16_spill] sm:$0xff] }
 0x314   : > { %v2057_v40 = vpop.f32.mrf.mxu3 }
 0x317   : > { %v4578_v14 = vpop.f32.mrf.mxu2 }
 0x318   : > { %v1751_v50 = vpop.f32.mrf.mxu1 }
 0x319   : > { %v4580_v34 = vadd.f32 %v1751_v50, %v1663_v25  ;;  %2099 = vmatmul.bf16.gmra.mxu3 %v4986_v43  ;;  %v2140_v50 = vadd.f32 %v4500_v45, %v2050_v60  ;;  %v2159_v60 = vpop.f32.mrf.mxu0 }
 0x31c   : > { %v2060_v32 = vpop.f32.mrf.mxu3 }
 0x31f   : > { %v1843_v2 = vpop.f32.mrf.mxu2 }
 0x320   : > { %v1754_v52 = vpop.f32.mrf.mxu1 }
 0x321   : > { %v1755_v18 = vadd.f32 %v1754_v52, %v1666_v9  ;;  %v2142_v9 = vadd.f32 %v4511_v21, %v2052_v29 }
 0x323   : > { %v4584_v20 = vadd.f32 %v1843_v2, %v1755_v18  ;;  %2262 = vmatmul.bf16.gmra.mxu1 %v4224_v22  ;;  %v4988_v18 = vld [vmem:[#allocation19_spill] sm:$0xff] }
 0x324   : > { %v2062_v30 = vpop.f32.mrf.mxu3 }
 0x328   : > { %v1756_v46 = vpop.f32.mrf.mxu1 }
 0x329   : > { %v4588_v27 = vadd.f32 %v1756_v46, %v1668_v24  ;;  %2104 = vmatmul.bf16.gmra.mxu3 %v4987_v44  ;;  %v2145_v46 = vadd.f32 %v4523_v53, %v2055_v36 }
 0x32c   : > { %v2065_v25 = vpop.f32.mrf.mxu3 }
 0x330   : > { %v2228_v43 = vpop.f32.mrf.mxu1 }
 0x331   : > { %v2229_v3 = vadd.f32 %v2228_v43, %v2140_v50  ;;  %v2147_v50 = vadd.f32 %v4531_v42, %v2057_v40 }
 0x333   : > { %2267 = vmatmul.bf16.gmra.mxu1 %v4245_v10  ;;  %v2308_v22 = vadd.f32 %v2229_v3, %v4302_v48 }
 0x334   : > { %v2067_v15 = vpop.f32.mrf.mxu3 }
 0x335   : > { %v2344_v2 = vadd.f32 %v4598_v26, %v2308_v22 }
 0x337   : > { %v2376_v24 = vmax.f32 %v2344_v2, 0.0 }
 0x338   : > { %v2230_v35 = vpop.f32.mrf.mxu1 }
 0x339   : > { %v2231_v52 = vadd.f32 %v2230_v35, %v2142_v9  ;;  %2109 = vmatmul.bf16.gmra.mxu3 %v4988_v18  ;;  %v4989_v35 = vld [vmem:[#allocation22_spill] sm:$0xff] }
 0x33b   : > { %v2309_v45 = vadd.f32 %v2231_v52, %v4318_v0  ;;  %v2161_v0 = vpop.f32.mrf.mxu0 }
 0x33c   : > { %v2070_v29 = vpop.f32.mrf.mxu3 }
 0x33d   : > { %v2345_v10 = vadd.f32 %v4598_v26, %v2309_v45 }
 0x33f   : > { %v2377_v21 = vmax.f32 %v2345_v10, 0.0  ;;  %v2150_v10 = vadd.f32 %v4542_v55, %v2060_v32 }
 0x340   : > { %v2233_v48 = vpop.f32.mrf.mxu1 }
 0x341   : > { %v2408_v44 = vpack.c.bf16 %v2377_v21, %v2376_v24  ;;  %v2234_v43 = vadd.f32 %v2233_v48, %v2145_v46  ;;  %v2152_v21 = vadd.f32 %v4552_v37, %v2062_v30 }
 0x343   : > { %2272 = vmatmul.bf16.gmra.mxu1 %v4266_v33  ;;  %2500 = vmatmul.bf16.vlgmr.msra.gmra.mxu2 %v2408_v44  ;;  %v2310_v3 = vadd.f32 %v2234_v43, %v4327_v28  ;;  %v2164_v40 = vpop.f32.mrf.mxu0  ;;  %v4990_v44 = vld [vmem:[#allocation26_spill] sm:$0xff] }
 0x344   : > { %v2072_v52 = vpop.f32.mrf.mxu3 }
 0x345   : > { %v2346_v18 = vadd.f32 %v4598_v26, %v2310_v3 }
 0x347   : > { %v2378_v36 = vmax.f32 %v2346_v18, 0.0  ;;  %v2157_v18 = vadd.f32 %v4570_v56, %v2067_v15 }
 0x348   : > { %v2235_v9 = vpop.f32.mrf.mxu1 }
 0x349   : > { %v2236_v22 = vadd.f32 %v2235_v9, %v2147_v50  ;;  %2114 = vmatmul.bf16.gmra.mxu3 %v4989_v35  ;;  %v2155_v35 = vadd.f32 %v4559_v12, %v2065_v25 }
 0x34b   : > { %v2311_v2 = vadd.f32 %v2236_v22, %v4343_v39  ;;  %v2166_v55 = vpop.f32.mrf.mxu0 }
 0x34c   : > { %v2075_v24 = vpop.f32.mrf.mxu3 }
 0x34d   : > { %v2347_v53 = vadd.f32 %v4598_v26, %v2311_v2 }
 0x34f   : > { %v2379_v45 = vmax.f32 %v2347_v53, 0.0 }
 0x350   : > { %v2238_v33 = vpop.f32.mrf.mxu1 }
 0x351   : > { %v2409_v42 = vpack.c.bf16 %v2379_v45, %v2378_v36  ;;  %v2239_v28 = vadd.f32 %v2238_v33, %v2150_v10 }
 0x353   : > { %2277 = vmatmul.bf16.gmra.mxu1 %v4289_v5  ;;  %2505 = vmatmul.bf16.gmra.mxu2 %v2409_v42  ;;  %v2312_v48 = vadd.f32 %v2239_v28, %v4354_v16  ;;  %v2169_v16 = vpop.f32.mrf.mxu0  ;;  %v2160_v28 = vadd.f32 %v2159_v60, %v2070_v29 }
 0x354   : > { %v2077_v3 = vpop.f32.mrf.mxu3 }
 0x355   : > { %v2348_v43 = vadd.f32 %v4598_v26, %v2312_v48 }
 0x357   : > { %v2380_v9 = vmax.f32 %v2348_v43, 0.0 }
 0x358   : > { %v2240_v46 = vpop.f32.mrf.mxu1 }
 0x359   : > { %v2241_v39 = vadd.f32 %v2240_v46, %v2152_v21  ;;  %2119 = vmatmul.bf16.gmra.mxu3 %v4990_v44 }
 0x35b   : > { %v2313_v50 = vadd.f32 %v2241_v39, %v4370_v58  ;;  %v2171_v42 = vpop.f32.mrf.mxu0 }
 0x35c   : > { %v2080_v58 = vpop.f32.mrf.mxu3 }
 0x35d   : > { %v2349_v32 = vadd.f32 %v4598_v26, %v2313_v50 }
 0x35f   : > { %v2381_v5 = vmax.f32 %v2349_v32, 0.0 }
 0x360   : > { %v2243_v22 = vpop.f32.mrf.mxu1 }
 0x361   : > { %v2410_v37 = vpack.c.bf16 %v2381_v5, %v2380_v9  ;;  %v2244_v30 = vadd.f32 %v2243_v22, %v2155_v35 }
 0x363   : > { %2282 = vmatmul.bf16.gmra.mxu1 %v4313_v8  ;;  %2510 = vmatmul.bf16.gmra.mxu2 %v2410_v37  ;;  %v2314_v2 = vadd.f32 %v2244_v30, %v4381_v59  ;;  %v2162_v59 = vadd.f32 %v2161_v0, %v2072_v52  ;;  %v2174_v44 = vpop.f32.mrf.mxu0  ;;  %v1796_v37 = vadd.f32 %v4430_v61, %v4434_v38 }
 0x364   : > { %v2082_v56 = vpop.f32.mrf.mxu3 }
 0x365   : > { %v2350_v45 = vadd.f32 %v4598_v26, %v2314_v2 }
 0x367   : > { %v2382_v25 = vmax.f32 %v2350_v45, 0.0 }
 0x368   : > { %v2245_v53 = vpop.f32.mrf.mxu1 }
 0x369   : > { %v2246_v36 = vadd.f32 %v2245_v53, %v2157_v18  ;;  %2124 = vmatmul.bf16.gmra.mxu3 %v4984_v6 }
 0x36b   : > { %v2315_v33 = vadd.f32 %v2246_v36, %v4395_v31  ;;  %v1791_v31 = vadd.f32 %v4412_v19, %v4416_v1  ;;  %v2167_v19 = vadd.f32 %v2166_v55, %v2077_v3  ;;  %v4991_v3 = vld [vmem:[#allocation23_spill] sm:$0xff] }
 0x36c   : > { %v2085_v32 = vpop.f32.mrf.mxu3 }
 0x36d   : > { %v2351_v12 = vadd.f32 %v4598_v26, %v2315_v33  ;;  %v2170_v33 = vadd.f32 %v2169_v16, %v2080_v58 }
 0x36f   : > { %v2383_v10 = vmax.f32 %v2351_v12, 0.0 }
 0x370   : > { %v2248_v8 = vpop.f32.mrf.mxu1 }
 0x371   : > { %v2411_v21 = vpack.c.bf16 %v2383_v10, %v2382_v25  ;;  %v2249_v15 = vadd.f32 %v2248_v8, %v2160_v28  ;;  %v1801_v25 = vadd.f32 %v4991_v3, %v4454_v23 }
 0x373   : > { %2287 = vmatmul.bf16.gmra.mxu1 %v4340_v7  ;;  %2515 = vmatmul.bf16.gmra.mxu2 %v2411_v21  ;;  %v2316_v48 = vadd.f32 %v2249_v15, %v4404_v63  ;;  %v2165_v7 = vadd.f32 %v2164_v40, %v2075_v24  ;;  %v2176_v63 = vpop.f32.mrf.mxu0 }
 0x374   : > { %v2087_v52 = vpop.f32.mrf.mxu3 }
 0x375   : > { %v2352_v43 = vadd.f32 %v4598_v26, %v2316_v48  ;;  %v2177_v23 = vadd.f32 %v2176_v63, %v2087_v52 }
 0x377   : > { %v2384_v29 = vmax.f32 %v2352_v43, 0.0 }
 0x378   : > { %v2250_v46 = vpop.f32.mrf.mxu1 }
 0x379   : > { %v2251_v39 = vadd.f32 %v2250_v46, %v2162_v59 }
 0x37b   : > { %v2317_v50 = vadd.f32 %v2251_v39, %v1791_v31  ;;  %v2179_v24 = vpop.f32.mrf.mxu0  ;;  %v4992_v31 = vld [vmem:[#allocation35_spill] sm:$0xff] }
 0x37d   : > { %v2353_v60 = vadd.f32 %v4598_v26, %v2317_v50  ;;  %v4993_v50 = vld [vmem:[#allocation38_spill] sm:$0xff] }
 0x37f   : > { %v2385_v9 = vmax.f32 %v2353_v60, 0.0  ;;  %v4994_v60 = vld [vmem:[#allocation27_spill] sm:$0xff] }
 0x380   : > { %v2253_v5 = vpop.f32.mrf.mxu1 }
 0x381   : > { %v2412_v22 = vpack.c.bf16 %v2385_v9, %v2384_v29  ;;  %v2254_v0 = vadd.f32 %v2253_v5, %v2165_v7  ;;  %v1806_v29 = vadd.f32 %v4994_v60, %v4993_v50 }
 0x383   : > { %2292 = vmatmul.bf16.gmra.mxu1 %v4367_v51  ;;  %2520 = vmatmul.bf16.gmra.mxu2 %v2412_v22  ;;  %v2318_v1 = vadd.f32 %v2254_v0, %v4426_v13  ;;  %v2090_v51 = vpop.f32.mrf.mxu3  ;;  %v2172_v13 = vadd.f32 %v2171_v42, %v2082_v56  ;;  %v2181_v10 = vpop.f32.mrf.mxu0 }
 0x385   : > { %v2354_v18 = vadd.f32 %v4598_v26, %v2318_v1  ;;  %v2180_v1 = vadd.f32 %v2179_v24, %v2090_v51 }
 0x387   : > { %v2386_v53 = vmax.f32 %v2354_v18, 0.0 }
 0x388   : > { %v2255_v35 = vpop.f32.mrf.mxu1 }
 0x389   : > { %v2256_v30 = vadd.f32 %v2255_v35, %v2167_v19 }
 0x38b   : > { %v2319_v2 = vadd.f32 %v2256_v30, %v1796_v37  ;;  %v2092_v28 = vpop.f32.mrf.mxu3  ;;  %v2184_v42 = vpop.f32.mrf.mxu0 }
 0x38c   : > { %v2182_v37 = vadd.f32 %v2181_v10, %v2092_v28 }
 0x38d   : > { %v2355_v40 = vadd.f32 %v4598_v26, %v2319_v2 }
 0x38f   : > { %v2387_v36 = vmax.f32 %v2355_v40, 0.0  ;;  %v4995_v40 = vld [vmem:[#allocation15_spill] sm:$0xff] }
 0x390   : > { %v2258_v45 = vpop.f32.mrf.mxu1 }
 0x391   : > { %v2413_v12 = vpack.c.bf16 %v2387_v36, %v2386_v53  ;;  %v2259_v55 = vadd.f32 %v2258_v45, %v2170_v33  ;;  %v4996_v53 = vld [vmem:[#allocation18_spill] sm:$0xff] }
 0x392   : > { %v1811_v36 = vadd.f32 %v4996_v53, %v4995_v40 }
 0x393   : > { %2297 = vmatmul.bf16.gmra.mxu1 %v4392_v4  ;;  %2525 = vmatmul.bf16.gmra.mxu2 %v2413_v12  ;;  %v2320_v61 = vadd.f32 %v2259_v55, %v4444_v11  ;;  %v2175_v4 = vadd.f32 %v2174_v44, %v2085_v32  ;;  %v2095_v11 = vpop.f32.mrf.mxu3  ;;  %v2186_v22 = vpop.f32.mrf.mxu0 }
 0x394   : > { %v2185_v3 = vadd.f32 %v2184_v42, %v2095_v11 }
 0x395   : > { %v2356_v21 = vadd.f32 %v4598_v26, %v2320_v61 }
 0x397   : > { %v2388_v58 = vmax.f32 %v2356_v21, 0.0 }
 0x398   : > { %v2260_v38 = vpop.f32.mrf.mxu1 }
 0x399   : > { %v2261_v8 = vadd.f32 %v2260_v38, %v2172_v13  ;;  %v4657_v13 = vpop.f32.mrf.mxu2 }
 0x39b   : > { %v2321_v15 = vadd.f32 %v2261_v8, %v1801_v25  ;;  %v2097_v32 = vpop.f32.mrf.mxu3  ;;  %v2189_v52 = vpop.f32.mrf.mxu0  ;;  %v4662_v8 = vld [vmem:[%s4839_s6] ss:$0 sm:$0xff] }
 0x39c   : > { %v2187_v21 = vadd.f32 %v2186_v22, %v2097_v32 }
 0x39d   : > { %v2357_v16 = vadd.f32 %v4598_v26, %v2321_v15 }
 0x39f   : > { %v2389_v59 = vmax.f32 %v2357_v16, 0.0 }
 0x3a0   : > { %v2263_v48 = vpop.f32.mrf.mxu1 }
 0x3a1   : > { %v2414_v46 = vpack.c.bf16 %v2389_v59, %v2388_v58  ;;  %v2264_v56 = vadd.f32 %v2263_v48, %v2175_v4  ;;  %v4997_v59 = vld [vmem:[#allocation21_spill] sm:$0xff]  ;;  %v3368_v4 = vld [vmem:[%s3763_s15] sm:$0xff] }
 0x3a2   : > { %v1816_v48 = vadd.f32 %v4997_v59, %v4505_v47 }
 0x3a3   : > { %2302 = vmatmul.bf16.gmra.mxu1 %v4984_v6  ;;  %2530 = vmatmul.bf16.gmra.mxu2 %v2414_v46  ;;  %v2322_v39 = vadd.f32 %v2264_v56, %v4992_v31  ;;  %v2100_v18 = vpop.f32.mrf.mxu3  ;;  %v2191_v38 = vpop.f32.mrf.mxu0 }
 0x3a5   : > { %v2358_v5 = vadd.f32 %v4598_v26, %v2322_v39 }
 0x3a7   : > { %v2390_v0 = vmax.f32 %v2358_v5, 0.0  ;;  %v3369_v5 = vld [vmem:[%s3763_s15 + $0x8] sm:$0xff] }
 0x3a8   : > { %v2265_v43 = vpop.f32.mrf.mxu1 }
 0x3a9   : > { %v2266_v9 = vadd.f32 %v2265_v43, %v2177_v23 }
 0x3ab   : > { %v2323_v7 = vadd.f32 %v2266_v9, %v1806_v29  ;;  %v2102_v25 = vpop.f32.mrf.mxu3  ;;  %v2194_v56 = vpop.f32.mrf.mxu0  ;;  %v2190_v9 = vadd.f32 %v2189_v52, %v2100_v18  ;;  %v4999_v52 = vld [vmem:[#allocation17_spill] sm:$0xff] }
 0x3ad   : > { %v2359_v44 = vadd.f32 %v4598_v26, %v2323_v7 }
 0x3af   : > { %v2391_v19 = vmax.f32 %v2359_v44, 0.0 }
 0x3b0   : > { %v2268_v6 = vpop.f32.mrf.mxu1 }
 0x3b1   : > { %v2415_v35 = vpack.c.bf16 %v2391_v19, %v2390_v0  ;;  %v2269_v63 = vadd.f32 %v2268_v6, %v2180_v1  ;;  %v2192_v1 = vadd.f32 %v2191_v38, %v2102_v25  ;;  %v3371_v25 = vld [vmem:[%s3763_s15 + $0x18] sm:$0xff] }
 0x3b3   : > { %2535 = vmatmul.bf16.gmra.mxu2 %v2415_v35  ;;  %v2324_v30 = vadd.f32 %v2269_v63, %v4481_v41  ;;  %v2105_v39 = vpop.f32.mrf.mxu3  ;;  %v2196_v0 = vpop.f32.mrf.mxu0 }
 0x3b5   : > { %v2360_v33 = vadd.f32 %v4598_v26, %v2324_v30  ;;  %v4998_v30 = vld [vmem:[#allocation25_spill] sm:$0xff] }
 0x3b6   : > { %v1821_v18 = vadd.f32 %v4999_v52, %v4998_v30 }
 0x3b7   : > { %v2392_v24 = vmax.f32 %v2360_v33, 0.0 }
 0x3b8   : > { %v2270_v2 = vpop.f32.mrf.mxu1 }
 0x3b9   : > { %v2271_v45 = vadd.f32 %v2270_v2, %v2182_v37  ;;  %v3370_v2 = vld [vmem:[%s3763_s15 + $0x10] sm:$0xff] }
 0x3bb   : > { %v2325_v12 = vadd.f32 %v2271_v45, %v1811_v36  ;;  %v2107_v19 = vpop.f32.mrf.mxu3 }
 0x3bd   : > { %v2361_v55 = vadd.f32 %v4598_v26, %v2325_v12 }
 0x3bf   : > { %v2393_v51 = vmax.f32 %v2361_v55, 0.0 }
 0x3c0   : > { %v2273_v61 = vpop.f32.mrf.mxu1 }
 0x3c1   : > { %v2416_v41 = vpack.c.bf16 %v2393_v51, %v2392_v24  ;;  %v2274_v10 = vadd.f32 %v2273_v61, %v2185_v3 }
 0x3c3   : > { %2540 = vmatmul.bf16.gmra.mxu2 %v2416_v41  ;;  %v2326_v15 = vadd.f32 %v2274_v10, %v4496_v54  ;;  %v2110_v38 = vpop.f32.mrf.mxu3  ;;  %v2195_v41 = vadd.f32 %v2194_v56, %v2105_v39  ;;  %v3372_v56 = vld [vmem:[%s3763_s15 + $0x20] sm:$0xff] }
 0x3c5   : > { %v2362_v11 = vadd.f32 %v4598_v26, %v2326_v15 }
 0x3c6   : > { %v2501_v28 = vpop.f32.mrf.mxu2 }
 0x3c7   : > { %v2502_v16 = vadd.f32 %v4662_v8, %v2501_v28  ;;  %v2394_v47 = vmax.f32 %v2362_v11, 0.0 }
 0x3c8   : > { %v2275_v58 = vpop.f32.mrf.mxu1 }
 0x3c9   : > { %v2581_v46 = vadd.f32 %v3368_v4, %v2502_v16  ;;  %v2276_v42 = vadd.f32 %v2275_v58, %v2187_v21  ;;  %v2197_v58 = vadd.f32 %v2196_v0, %v2107_v19 }
 0x3cb   : > { %v2613_v23 = vmax.f32 %v2581_v46, 0.0  ;;  %v2327_v31 = vadd.f32 %v2276_v42, %v1816_v48  ;;  %v5000_v46 = vld [vmem:[#allocation53_spill] sm:$0xff]  ;;  %v5001_v42 = vld [vmem:[#allocation20_spill] sm:$0xff] }
 0x3cc   : > { %v1826_v11 = vadd.f32 %v5001_v42, %v5000_v46  ;;  %v5004_v46 = vld [vmem:[#allocation55_spill] sm:$0xff] }
 0x3cd   : > { %2645 = vst [vmem:[%s4672_s23] sm:$0xff] %v2613_v23  ;;  %v2363_v54 = vadd.f32 %v4598_v26, %v2327_v31 }
 0x3ce   : > { %v2503_v43 = vpop.f32.mrf.mxu2 }
 0x3cf   : > { %v2395_v50 = vmax.f32 %v2363_v54, 0.0  ;;  %v2504_v60 = vadd.f32 %v4662_v8, %v2503_v43  ;;  %v2112_v54 = vpop.f32.mrf.mxu3 }
 0x3d0   : > { %v2278_v29 = vpop.f32.mrf.mxu1 }
 0x3d1   : > { %v2582_v7 = vadd.f32 %v3369_v5, %v2504_v60  ;;  %v2417_v22 = vpack.c.bf16 %v2395_v50, %v2394_v47  ;;  %v2279_v32 = vadd.f32 %v2278_v29, %v2190_v9 }
 0x3d3   : > { %v2614_v44 = vmax.f32 %v2582_v7, 0.0  ;;  %2545 = vmatmul.bf16.gmra.mxu2 %v2417_v22  ;;  %v2328_v35 = vadd.f32 %v2279_v32, %v4513_v49  ;;  %v2199_v49 = vpop.f32.mrf.mxu0 }
 0x3d4   : > { %v2200_v22 = vadd.f32 %v2199_v49, %v2110_v38 }
 0x3d5   : > { %2646 = vst [vmem:[%s4672_s23 + $0x8] sm:$0xff] %v2614_v44  ;;  %v2364_v36 = vadd.f32 %v4598_v26, %v2328_v35  ;;  %v3373_v44 = vld [vmem:[%s3763_s15 + $0x28] sm:$0xff] }
 0x3d6   : > { %v2506_v6 = vpop.f32.mrf.mxu2 }
 0x3d7   : > { %v2507_v63 = vadd.f32 %v4662_v8, %v2506_v6  ;;  %v2396_v24 = vmax.f32 %v2364_v36, 0.0  ;;  %v2115_v35 = vpop.f32.mrf.mxu3  ;;  %v3374_v36 = vld [vmem:[%s3763_s15 + $0x30] sm:$0xff] }
 0x3d8   : > { %v2280_v37 = vpop.f32.mrf.mxu1 }
 0x3d9   : > { %v2583_v40 = vadd.f32 %v3370_v2, %v2507_v63  ;;  %v2281_v53 = vadd.f32 %v2280_v37, %v2192_v1  ;;  %v5002_v2 = vld [vmem:[#allocation28_spill] sm:$0xff] }
 0x3db   : > { %v2615_v45 = vmax.f32 %v2583_v40, 0.0  ;;  %v2329_v33 = vadd.f32 %v2281_v53, %v1821_v18  ;;  %v2201_v23 = vpop.f32.mrf.mxu0  ;;  %v5003_v40 = vld [vmem:[#allocation54_spill] sm:$0xff] }
 0x3dc   : > { %v2202_v37 = vadd.f32 %v2201_v23, %v2112_v54  ;;  %v1831_v53 = vadd.f32 %v5003_v40, %v5002_v2 }
 0x3dd   : > { %2647 = vst [vmem:[%s4672_s23 + $0x10] sm:$0xff] %v2615_v45  ;;  %v2365_v12 = vadd.f32 %v4598_v26, %v2329_v33 }
 0x3de   : > { %v2508_v55 = vpop.f32.mrf.mxu2 }
 0x3df   : > { %v2397_v51 = vmax.f32 %v2365_v12, 0.0  ;;  %v2509_v61 = vadd.f32 %v4662_v8, %v2508_v55 }
 0x3e0   : > { %v2283_v3 = vpop.f32.mrf.mxu1 }
 0x3e1   : > { %v2584_v10 = vadd.f32 %v3371_v25, %v2509_v61  ;;  %v2418_v28 = vpack.c.bf16 %v2397_v51, %v2396_v24  ;;  %v2284_v15 = vadd.f32 %v2283_v3, %v2195_v41 }
 0x3e3   : > { %v2616_v21 = vmax.f32 %v2584_v10, 0.0  ;;  %2550 = vmatmul.bf16.gmra.mxu2 %v2418_v28  ;;  %v2330_v59 = vadd.f32 %v2284_v15, %v4528_v17  ;;  %v2204_v19 = vpop.f32.mrf.mxu0  ;;  %v3375_v28 = vld [vmem:[%s3763_s15 + $0x38] sm:$0xff] }
 0x3e4   : > { %v2205_v10 = vadd.f32 %v2204_v19, %v2115_v35  ;;  %v3377_v19 = vld [vmem:[%s3763_s15 + $0x48] sm:$0xff] }
 0x3e5   : > { %2648 = vst [vmem:[%s4672_s23 + $0x18] sm:$0xff] %v2616_v21  ;;  %v2366_v43 = vadd.f32 %v4598_v26, %v2330_v59 }
 0x3e6   : > { %v2511_v16 = vpop.f32.mrf.mxu2 }
 0x3e7   : > { %v2512_v48 = vadd.f32 %v4662_v8, %v2511_v16  ;;  %v2398_v29 = vmax.f32 %v2366_v43, 0.0  ;;  %v3376_v43 = vld [vmem:[%s3763_s15 + $0x40] sm:$0xff] }
 0x3e8   : > { %v2285_v4 = vpop.f32.mrf.mxu1 }
 0x3e9   : > { %v2585_v31 = vadd.f32 %v3372_v56, %v2512_v48  ;;  %v2286_v39 = vadd.f32 %v2285_v4, %v2197_v58 }
 0x3eb   : > { %v2617_v47 = vmax.f32 %v2585_v31, 0.0  ;;  %v2331_v50 = vadd.f32 %v2286_v39, %v1826_v11  ;;  %v2206_v24 = vpop.f32.mrf.mxu0  ;;  %v5005_v31 = vld [vmem:[#allocation56_spill] sm:$0xff]  ;;  %v5006_v39 = vld [vmem:[#allocation34_spill] sm:$0xff] }
 0x3ec   : > { %v1836_v54 = vadd.f32 %v5006_v39, %v5005_v31 }
 0x3ed   : > { %2649 = vst [vmem:[%s4672_s23 + $0x20] sm:$0xff] %v2617_v47  ;;  %v2367_v17 = vadd.f32 %v4598_v26, %v2331_v50 }
 0x3ee   : > { %v2513_v60 = vpop.f32.mrf.mxu2 }
 0x3ef   : > { %v2399_v9 = vmax.f32 %v2367_v17, 0.0  ;;  %v2514_v5 = vadd.f32 %v4662_v8, %v2513_v60 }
 0x3f0   : > { %v2288_v7 = vpop.f32.mrf.mxu1 }
 0x3f1   : > { %v2586_v32 = vadd.f32 %v3373_v44, %v2514_v5  ;;  %v2419_v0 = vpack.c.bf16 %v2399_v9, %v2398_v29  ;;  %v2289_v1 = vadd.f32 %v2288_v7, %v2200_v22 }
 0x3f3   : > { %v2618_v6 = vmax.f32 %v2586_v32, 0.0  ;;  %2555 = vmatmul.bf16.gmra.mxu2 %v2419_v0  ;;  %v2332_v30 = vadd.f32 %v2289_v1, %v4545_v62  ;;  %v2117_v62 = vpop.f32.mrf.mxu3  ;;  %v2209_v48 = vpop.f32.mrf.mxu0 }
 0x3f4   : > { %v2207_v4 = vadd.f32 %v2206_v24, %v2117_v62 }
 0x3f5   : > { %2650 = vst [vmem:[%s4672_s23 + $0x28] sm:$0xff] %v2618_v6  ;;  %v2368_v12 = vadd.f32 %v4598_v26, %v2332_v30 }
 0x3f6   : > { %v2516_v63 = vpop.f32.mrf.mxu2 }
 0x3f7   : > { %v2517_v52 = vadd.f32 %v4662_v8, %v2516_v63  ;;  %v2400_v38 = vmax.f32 %v2368_v12, 0.0 }
 0x3f8   : > { %v2290_v18 = vpop.f32.mrf.mxu1 }
 0x3f9   : > { %v2587_v45 = vadd.f32 %v3374_v36, %v2517_v52  ;;  %v2291_v33 = vadd.f32 %v2290_v18, %v2202_v37  ;;  %v1841_v36 = vadd.f32 %v4578_v14, %v4580_v34 }
 0x3fb   : > { %v2619_v55 = vmax.f32 %v2587_v45, 0.0  ;;  %v2333_v49 = vadd.f32 %v2291_v33, %v1831_v53  ;;  %v2120_v23 = vpop.f32.mrf.mxu3  ;;  %v2211_v35 = vpop.f32.mrf.mxu0  ;;  %v3378_v45 = vld [vmem:[%s3763_s15 + $0x50] sm:$0xff] }
 0x3fc   : > { %v2210_v0 = vadd.f32 %v2209_v48, %v2120_v23  ;;  %v3380_v23 = vld [vmem:[%s3763_s15 + $0x60] sm:$0xff] }
 0x3fd   : > { %2651 = vst [vmem:[%s4672_s23 + $0x30] sm:$0xff] %v2619_v55  ;;  %v2369_v51 = vadd.f32 %v4598_v26, %v2333_v49 }
 0x3fe   : > { %v2518_v61 = vpop.f32.mrf.mxu2 }
 0x3ff   : > { %v2401_v3 = vmax.f32 %v2369_v51, 0.0  ;;  %v2519_v41 = vadd.f32 %v4662_v8, %v2518_v61 }
 0x400   : > { %v2293_v25 = vpop.f32.mrf.mxu1 }
 0x401   : > { %v2588_v21 = vadd.f32 %v3375_v28, %v2519_v41  ;;  %v2420_v15 = vpack.c.bf16 %v2401_v3, %v2400_v38  ;;  %v2294_v58 = vadd.f32 %v2293_v25, %v2205_v10  ;;  %v3379_v25 = vld [vmem:[%s3763_s15 + $0x58] sm:$0xff] }
 0x403   : > { %v2620_v16 = vmax.f32 %v2588_v21, 0.0  ;;  %2560 = vmatmul.bf16.gmra.mxu2 %v2420_v15  ;;  %v2334_v42 = vadd.f32 %v2294_v58, %v5004_v46  ;;  %v2122_v63 = vpop.f32.mrf.mxu3  ;;  %v2214_v49 = vpop.f32.mrf.mxu0 }
 0x404   : > { %v2212_v18 = vadd.f32 %v2211_v35, %v2122_v63 }
 0x405   : > { %2652 = vst [vmem:[%s4672_s23 + $0x38] sm:$0xff] %v2620_v16  ;;  %v2370_v17 = vadd.f32 %v4598_v26, %v2334_v42 }
 0x406   : > { %v2521_v59 = vpop.f32.mrf.mxu2 }
 0x407   : > { %v2522_v11 = vadd.f32 %v4662_v8, %v2521_v59  ;;  %v2402_v7 = vmax.f32 %v2370_v17, 0.0 }
 0x408   : > { %v2295_v56 = vpop.f32.mrf.mxu1 }
 0x409   : > { %v2589_v47 = vadd.f32 %v3376_v43, %v2522_v11  ;;  %v2296_v50 = vadd.f32 %v2295_v56, %v2207_v4  ;;  %v1846_v11 = vadd.f32 %v4657_v13, %v4588_v27  ;;  %v3381_v27 = vld [vmem:[%s3763_s15 + $0x68] sm:$0xff] }
 0x40b   : > { %v2621_v60 = vmax.f32 %v2589_v47, 0.0  ;;  %v2335_v29 = vadd.f32 %v2296_v50, %v1836_v54  ;;  %v2125_v55 = vpop.f32.mrf.mxu3  ;;  %v2216_v58 = vpop.f32.mrf.mxu0 }
 0x40c   : > { %v2215_v3 = vadd.f32 %v2214_v49, %v2125_v55 }
 0x40d   : > { %2653 = vst [vmem:[%s4672_s23 + $0x40] sm:$0xff] %v2621_v60  ;;  %v2371_v9 = vadd.f32 %v4598_v26, %v2335_v29 }
 0x40e   : > { %v2523_v5 = vpop.f32.mrf.mxu2 }
 0x40f   : > { %v2403_v22 = vmax.f32 %v2371_v9, 0.0  ;;  %v2524_v44 = vadd.f32 %v4662_v8, %v2523_v5 }
 0x410   : > { %v2298_v32 = vpop.f32.mrf.mxu1 }
 0x411   : > { %v2590_v6 = vadd.f32 %v3377_v19, %v2524_v44  ;;  %v2421_v1 = vpack.c.bf16 %v2403_v22, %v2402_v7  ;;  %v2299_v30 = vadd.f32 %v2298_v32, %v2210_v0  ;;  %v3383_v19 = vld [vmem:[%s3763_s15 + $0x78] sm:$0xff] }
 0x413   : > { %v2622_v37 = vmax.f32 %v2590_v6, 0.0  ;;  %2565 = vmatmul.bf16.gmra.mxu2 %v2421_v1  ;;  %v2336_v2 = vadd.f32 %v2299_v30, %v4574_v57  ;;  %v2127_v16 = vpop.f32.mrf.mxu3 }
 0x414   : > { %v2217_v48 = vadd.f32 %v2216_v58, %v2127_v16 }
 0x415   : > { %2654 = vst [vmem:[%s4672_s23 + $0x48] sm:$0xff] %v2622_v37  ;;  %v2372_v24 = vadd.f32 %v4598_v26, %v2336_v2  ;;  %v3384_v37 = vld [vmem:[%s3763_s15 + $0x80] sm:$0xff] }
 0x416   : > { %v2526_v52 = vpop.f32.mrf.mxu2 }
 0x417   : > { %v2527_v40 = vadd.f32 %v4662_v8, %v2526_v52  ;;  %v2404_v38 = vmax.f32 %v2372_v24, 0.0 }
 0x418   : > { %v2300_v53 = vpop.f32.mrf.mxu1 }
 0x419   : > { %v2591_v33 = vadd.f32 %v3378_v45, %v2527_v40  ;;  %v2301_v12 = vadd.f32 %v2300_v53, %v2212_v18  ;;  %v3385_v40 = vld [vmem:[%s3763_s15 + $0x88] sm:$0xff] }
 0x41b   : > { %v2623_v51 = vmax.f32 %v2591_v33, 0.0  ;;  %v2337_v62 = vadd.f32 %v2301_v12, %v1841_v36  ;;  %v3386_v12 = vld [vmem:[%s3763_s15 + $0x90] sm:$0xff] }
 0x41d   : > { %2655 = vst [vmem:[%s4672_s23 + $0x50] sm:$0xff] %v2623_v51  ;;  %v2373_v57 = vadd.f32 %v4598_v26, %v2337_v62  ;;  %v3387_v62 = vld [vmem:[%s3763_s15 + $0x98] sm:$0xff] }
 0x41e   : > { %v2528_v61 = vpop.f32.mrf.mxu2 }
 0x41f   : > { %v2405_v41 = vmax.f32 %v2373_v57, 0.0  ;;  %v2529_v14 = vadd.f32 %v4662_v8, %v2528_v61 }
 0x420   : > { %v2303_v34 = vpop.f32.mrf.mxu1 }
 0x421   : > { %v2592_v10 = vadd.f32 %v3379_v25, %v2529_v14  ;;  %v2422_v28 = vpack.c.bf16 %v2405_v41, %v2404_v38  ;;  %v2304_v15 = vadd.f32 %v2303_v34, %v2215_v3  ;;  %v3388_v41 = vld [vmem:[%s3763_s15 + $0xa0] sm:$0xff] }
 0x423   : > { %v2624_v21 = vmax.f32 %v2592_v10, 0.0  ;;  %2570 = vmatmul.bf16.gmra.mxu2 %v2422_v28  ;;  %v2338_v4 = vadd.f32 %v2304_v15, %v4584_v20  ;;  %v3389_v28 = vld [vmem:[%s3763_s15 + $0xa8] sm:$0xff] }
 0x425   : > { %2656 = vst [vmem:[%s4672_s23 + $0x58] sm:$0xff] %v2624_v21  ;;  %v2374_v39 = vadd.f32 %v4598_v26, %v2338_v4 }
 0x426   : > { %v2531_v59 = vpop.f32.mrf.mxu2 }
 0x427   : > { %v2532_v46 = vadd.f32 %v4662_v8, %v2531_v59  ;;  %v2406_v50 = vmax.f32 %v2374_v39, 0.0  ;;  %v3390_v59 = vld [vmem:[%s3763_s15 + $0xb0] sm:$0xff] }
 0x428   : > { %v2305_v42 = vpop.f32.mrf.mxu1 }
 0x429   : > { %v2593_v56 = vadd.f32 %v3380_v23, %v2532_v46  ;;  %v2306_v31 = vadd.f32 %v2305_v42, %v2217_v48 }
 0x42b   : > { %v2625_v54 = vmax.f32 %v2593_v56, 0.0  ;;  %v2339_v43 = vadd.f32 %v2306_v31, %v1846_v11  ;;  %v3391_v11 = vld [vmem:[%s3763_s15 + $0xb8] sm:$0xff] }
 0x42d   : > { %2657 = vst [vmem:[%s4672_s23 + $0x60] sm:$0xff] %v2625_v54  ;;  %v2375_v47 = vadd.f32 %v4598_v26, %v2339_v43  ;;  %v3382_v26 = vld [vmem:[%s3763_s15 + $0x70] sm:$0xff]  ;;  %v3392_v54 = vld [vmem:[%s3763_s15 + $0xc0] sm:$0xff] }
 0x42e   : > { %v2533_v20 = vpop.f32.mrf.mxu2 }
 0x42f   : > { %v2407_v17 = vmax.f32 %v2375_v47, 0.0  ;;  %v2534_v60 = vadd.f32 %v4662_v8, %v2533_v20 }
 0x431   : > { %v2594_v13 = vadd.f32 %v3381_v27, %v2534_v60  ;;  %v2423_v29 = vpack.c.bf16 %v2407_v17, %v2406_v50  ;;  %v3393_v17 = vld [vmem:[%s3763_s15 + $0xc8] sm:$0xff] }
 0x433   : > { %v2626_v9 = vmax.f32 %v2594_v13, 0.0  ;;  %2575 = vmatmul.bf16.gmra.mxu2 %v2423_v29 }
 0x435   : > { %2658 = vst [vmem:[%s4672_s23 + $0x68] sm:$0xff] %v2626_v9  ;;  %v3394_v9 = vld [vmem:[%s3763_s15 + $0xd0] sm:$0xff] }
 0x436   : > { %v2536_v5 = vpop.f32.mrf.mxu2 }
 0x437   : > { %v2537_v7 = vadd.f32 %v4662_v8, %v2536_v5 }
 0x439   : > { %v2595_v22 = vadd.f32 %v3382_v26, %v2537_v7 }
 0x43b   : > { %v2627_v44 = vmax.f32 %v2595_v22, 0.0 }
 0x43d   : > { %2659 = vst [vmem:[%s4672_s23 + $0x70] sm:$0xff] %v2627_v44  ;;  %v3395_v44 = vld [vmem:[%s3763_s15 + $0xd8] sm:$0xff] }
 0x43e   : > { %v2538_v32 = vpop.f32.mrf.mxu2 }
 0x43f   : > { %v2539_v0 = vadd.f32 %v4662_v8, %v2538_v32 }
 0x441   : > { %v2596_v6 = vadd.f32 %v3383_v19, %v2539_v0 }
 0x443   : > { %v2628_v1 = vmax.f32 %v2596_v6, 0.0 }
 0x445   : > { %2660 = vst [vmem:[%s4672_s23 + $0x78] sm:$0xff] %v2628_v1  ;;  %v3396_v1 = vld [vmem:[%s3763_s15 + $0xe0] sm:$0xff] }
 0x446   : > { %v2541_v35 = vpop.f32.mrf.mxu2 }
 0x447   : > { %v2542_v63 = vadd.f32 %v4662_v8, %v2541_v35 }
 0x449   : > { %v2597_v30 = vadd.f32 %v3384_v37, %v2542_v63 }
 0x44b   : > { %v2629_v52 = vmax.f32 %v2597_v30, 0.0 }
 0x44d   : > { %2661 = vst [vmem:[%s4672_s23 + $0x80] sm:$0xff] %v2629_v52  ;;  %v3397_v52 = vld [vmem:[%s3763_s15 + $0xe8] sm:$0xff] }
 0x44e   : > { %v2543_v18 = vpop.f32.mrf.mxu2 }
 0x44f   : > { %v2544_v2 = vadd.f32 %v4662_v8, %v2543_v18 }
 0x451   : > { %v2598_v53 = vadd.f32 %v3385_v40, %v2544_v2 }
 0x453   : > { %v2630_v36 = vmax.f32 %v2598_v53, 0.0 }
 0x455   : > { %2662 = vst [vmem:[%s4672_s23 + $0x88] sm:$0xff] %v2630_v36  ;;  %v3398_v36 = vld [vmem:[%s3763_s15 + $0xf0] sm:$0xff] }
 0x456   : > { %v2546_v45 = vpop.f32.mrf.mxu2 }
 0x457   : > { %v2547_v33 = vadd.f32 %v4662_v8, %v2546_v45 }
 0x459   : > { %v2599_v55 = vadd.f32 %v3386_v12, %v2547_v33 }
 0x45b   : > { %v2631_v49 = vmax.f32 %v2599_v55, 0.0 }
 0x45d   : > { %2663 = vst [vmem:[%s4672_s23 + $0x90] sm:$0xff] %v2631_v49  ;;  %v3399_v49 = vld [vmem:[%s3763_s15 + $0xf8] sm:$0xff] }
 0x45e   : > { %v2548_v24 = vpop.f32.mrf.mxu2 }
 0x45f   : > { %v2549_v51 = vadd.f32 %v4662_v8, %v2548_v24 }
 0x461   : > { %v2600_v57 = vadd.f32 %v3387_v62, %v2549_v51 }
 0x463   : > { %v2632_v61 = vmax.f32 %v2600_v57, 0.0 }
 0x465   : > { %2664 = vst [vmem:[%s4672_s23 + $0x98] sm:$0xff] %v2632_v61 }
 0x466   : > { %v2551_v38 = vpop.f32.mrf.mxu2 }
 0x467   : > { %v2552_v3 = vadd.f32 %v4662_v8, %v2551_v38 }
 0x469   : > { %v2601_v14 = vadd.f32 %v3388_v41, %v2552_v3 }
 0x46b   : > { %v2633_v34 = vmax.f32 %v2601_v14, 0.0 }
 0x46d   : > { %2665 = vst [vmem:[%s4672_s23 + $0xa0] sm:$0xff] %v2633_v34 }
 0x46e   : > { %v2553_v25 = vpop.f32.mrf.mxu2 }
 0x46f   : > { %v2554_v10 = vadd.f32 %v4662_v8, %v2553_v25 }
 0x471   : > { %v2602_v21 = vadd.f32 %v3389_v28, %v2554_v10 }
 0x473   : > { %v2634_v15 = vmax.f32 %v2602_v21, 0.0 }
 0x475   : > { %2666 = vst [vmem:[%s4672_s23 + $0xa8] sm:$0xff] %v2634_v15 }
 0x476   : > { %v2556_v16 = vpop.f32.mrf.mxu2 }
 0x477   : > { %v2557_v58 = vadd.f32 %v4662_v8, %v2556_v16 }
 0x479   : > { %v2603_v48 = vadd.f32 %v3390_v59, %v2557_v58 }
 0x47b   : > { %v2635_v4 = vmax.f32 %v2603_v48, 0.0 }
 0x47d   : > { %2667 = vst [vmem:[%s4672_s23 + $0xb0] sm:$0xff] %v2635_v4 }
 0x47e   : > { %v2558_v46 = vpop.f32.mrf.mxu2 }
 0x47f   : > { %v2559_v42 = vadd.f32 %v4662_v8, %v2558_v46 }
 0x481   : > { %v2604_v23 = vadd.f32 %v3391_v11, %v2559_v42 }
 0x483   : > { %v2636_v56 = vmax.f32 %v2604_v23, 0.0 }
 0x485   : > { %2668 = vst [vmem:[%s4672_s23 + $0xb8] sm:$0xff] %v2636_v56 }
 0x486   : > { %v2561_v31 = vpop.f32.mrf.mxu2 }
 0x487   : > { %v2562_v39 = vadd.f32 %v4662_v8, %v2561_v31 }
 0x489   : > { %v2605_v43 = vadd.f32 %v3392_v54, %v2562_v39 }
 0x48b   : > { %v2637_v47 = vmax.f32 %v2605_v43, 0.0 }
 0x48d   : > { %2669 = vst [vmem:[%s4672_s23 + $0xc0] sm:$0xff] %v2637_v47 }
 0x48e   : > { %v2563_v20 = vpop.f32.mrf.mxu2 }
 0x48f   : > { %v2564_v50 = vadd.f32 %v4662_v8, %v2563_v20 }
 0x491   : > { %v2606_v60 = vadd.f32 %v3393_v17, %v2564_v50 }
 0x493   : > { %v2638_v27 = vmax.f32 %v2606_v60, 0.0 }
 0x495   : > { %2670 = vst [vmem:[%s4672_s23 + $0xc8] sm:$0xff] %v2638_v27 }
 0x496   : > { %v2566_v13 = vpop.f32.mrf.mxu2 }
 0x497   : > { %v2567_v29 = vadd.f32 %v4662_v8, %v2566_v13 }
 0x499   : > { %v2607_v5 = vadd.f32 %v3394_v9, %v2567_v29 }
 0x49b   : > { %v2639_v7 = vmax.f32 %v2607_v5, 0.0 }
 0x49d   : > { %2671 = vst [vmem:[%s4672_s23 + $0xd0] sm:$0xff] %v2639_v7 }
 0x49e   : > { %v2568_v26 = vpop.f32.mrf.mxu2 }
 0x49f   : > { %v2569_v22 = vadd.f32 %v4662_v8, %v2568_v26 }
 0x4a1   : > { %v2608_v32 = vadd.f32 %v3395_v44, %v2569_v22 }
 0x4a3   : > { %v2640_v0 = vmax.f32 %v2608_v32, 0.0 }
 0x4a5   : > { %2672 = vst [vmem:[%s4672_s23 + $0xd8] sm:$0xff] %v2640_v0 }
 0x4a6   : > { %v2571_v19 = vpop.f32.mrf.mxu2 }
 0x4a7   : > { %v2572_v6 = vadd.f32 %v4662_v8, %v2571_v19 }
 0x4a9   : > { %v2609_v35 = vadd.f32 %v3396_v1, %v2572_v6 }
 0x4ab   : > { %v2641_v63 = vmax.f32 %v2609_v35, 0.0 }
 0x4ad   : > { %2673 = vst [vmem:[%s4672_s23 + $0xe0] sm:$0xff] %v2641_v63 }
 0x4ae   : > { %v2573_v37 = vpop.f32.mrf.mxu2 }
 0x4af   : > { %v2574_v30 = vadd.f32 %v4662_v8, %v2573_v37 }
 0x4b1   : > { %v2610_v18 = vadd.f32 %v3397_v52, %v2574_v30 }
 0x4b3   : > { %v2642_v2 = vmax.f32 %v2610_v18, 0.0 }
 0x4b5   : > { %2674 = vst [vmem:[%s4672_s23 + $0xe8] sm:$0xff] %v2642_v2 }
 0x4b6   : > { %v2576_v40 = vpop.f32.mrf.mxu2 }
 0x4b7   : > { %v2577_v53 = vadd.f32 %v4662_v8, %v2576_v40 }
 0x4b9   : > { %v2611_v45 = vadd.f32 %v3398_v36, %v2577_v53 }
 0x4bb   : > { %v2643_v33 = vmax.f32 %v2611_v45, 0.0 }
 0x4bd   : > { %2675 = vst [vmem:[%s4672_s23 + $0xf0] sm:$0xff] %v2643_v33 }
 0x4be   : > { %v2578_v12 = vpop.f32.mrf.mxu2 }
 0x4bf   : > { %v2579_v55 = vadd.f32 %v4662_v8, %v2578_v12 }
 0x4c1   : > { %v2612_v24 = vadd.f32 %v3399_v49, %v2579_v55 }
 0x4c3   : > { %v2644_v51 = vmax.f32 %v2612_v24, 0.0 }
 0x4c5   : > { %2676 = vst [vmem:[%s4672_s23 + $0xf8] sm:$0xff] %v2644_v51 }
 0x4c6   : > { %3547 = shalt.err (!%p3544_p10)
}
 0x4c7   : > { %s3604_s22 = smov 128   ;;  %s3605_s15 = smov 8  }
 0x4c8   : > { %3295 = dma.vmem_to_hbm [thread:$0]  (%p3729_p7), %s2691_s16, 4096, %s2693_s1, %s2678_s30, %s3604_s22, %s3604_s22, %s3605_s15  }
 0x4c9 PF: > { %s2707_s23 = sand.u32 1, %s3582_s24   ;;  %p5007_p12 = scmp.ge.s32.totalorder %s3594_s27, 2 }
 0x4ca   : > { %s2708_s20 = scalar_lea.sflag [#allocation4], %s2707_s23 }
 0x4cb   : > { %p3312_p13 = pnand %p5007_p12, %p3681_p6 }
 0x4cd   : > { %p3313_p0 = pneg %p3312_p13 }
 0x4cf   : > { %3577 = dma.done.wait (%p3313_p0), %s2708_s20, 4096  }
 0x4d0   : > { %3579 = vsyncadd (%p3313_p0), %s2708_s20, 4294963200  ;;  %p22_p3 = scmp.ge.s32.totalorder %s3713_s11, 4   ;;  %s5008_s24 = smov %s3586_s25 }
 0x4d1   : > { %s5009_s25 = smov %s3590_s26  ;;  %s5010_s26 = smov %s3725_s17 }
 0x4d2   : > { %s5011_s27 = smov %s3713_s11  ;;  %24 = sbr.rel (!%p22_p3) target bundleno = 9 (0x9), region = 107 }
 0x4d7   :  { %2714 = vsyncpa [#allocation3], 1 }
 0x4d8   :  { %2716 = vsyncpa [#allocation3 + $0x1], 1 }
 0x4d9   :  { %2717 = vsyncpa [#allocation6], 1 }
 0x4da   :  { %2718 = vsyncpa [#allocation9], 1 }
 0x4db   :  { %2719 = vsyncpa [#allocation4], 1 }
 0x4dc   :  { %2721 = vsyncpa [#allocation4 + $0x1], 1 }

</bundles_post_ra>
